<compile_context>
chip_gen: v6e
topology: v6e:2x2x1
jax: 0.10.0
libtpu: 0.0.40
codegen_flags: <defaults>
</compile_context>

<pallas_src>
import jax
import jax.numpy as jnp
from jax import lax
from jax.experimental import pallas as pl
from jax.experimental.pallas import tpu as pltpu

# ---------------- small synthetic OpenAI-GPT config ----------------
VOCAB = 64      # vocab size (incl. added special tokens)
N_POS = 32      # n_positions (max_pos)
HIDDEN = 32     # n_embd
N_HEAD = 4
N_LAYER = 2
DH = HIDDEN // N_HEAD
PAD_ID = 3      # synthetic id of '\n</w>'
UNK_ID = 5      # synthetic id of '<unk>'
LN_EPS = 1e-5
NEG_INF = -1e9


# ---------------- in-kernel helpers ----------------
def _gelu_new(x):
    return 0.5 * x * (1.0 + jnp.tanh(jnp.sqrt(2.0 / jnp.pi) * (x + 0.044715 * x * x * x)))


def _layernorm(x, g, b):
    mu = jnp.mean(x, axis=-1, keepdims=True)
    var = jnp.mean((x - mu) ** 2, axis=-1, keepdims=True)
    return (x - mu) * lax.rsqrt(var + LN_EPS) * g + b


# ---------------- fused forward kernel ----------------
def _make_gpt_kernel(need_lex):
    H, NH, dh = HIDDEN, N_HEAD, DH

    def kernel(raw_ref, wte_ref, pos_ref, bias_ref, wattn_ref, wmlp_ref, vec_ref,
               top_ref, *rest):
        lex_ref = rest[0] if need_lex else None

        # ---- correct_sent_indexing: AllenNLP ids -> transformer ids ----
        raw = raw_ref[...]                                           # (1, BS) int32
        pad_m = (raw == 0).astype(jnp.int32)
        unk_m = (raw == 1).astype(jnp.int32)
        valid_m = (raw > 1).astype(jnp.int32)
        ids = (raw - 2) * valid_m + PAD_ID * pad_m + UNK_ID * unk_m  # (1, BS)

        V = wte_ref.shape[0]
        BS = raw.shape[1]

        # ---- token embedding: whole-batch one-hot (V, BS) contracted on the MXU ----
        iota_v = lax.broadcasted_iota(jnp.int32, (V, BS), 0)
        onehot = (iota_v == ids).astype(jnp.float32)                 # (V, BS)
        tok = lax.dot_general(onehot, wte_ref[...],
                              dimension_numbers=(((0,), (0,)), ((), ())),
                              preferred_element_type=jnp.float32)    # (BS, H)
        if need_lex:
            lex_ref[...] = tok                                       # tokens_embed(ids)

        x = tok + pos_ref[...]                                       # + position embeddings
        bias = bias_ref[...]                                         # (BS, BS) additive

        # ---- N_LAYER post-LN GPT blocks, unrolled, all weights VMEM-resident ----
        # TODO(synk): switch to lax.fori_loop over ref[l] once N_LAYER grows beyond ~4.
        for l in range(N_LAYER):
            vec = vec_ref[l]                        # (8, 4H) packed per-layer vectors
            bqkv = vec[0:1, 0:3 * H]                # (1, 3H)  (q part pre-scaled)
            bfc = vec[1:2, 0:4 * H]                 # (1, 4H)
            bo = vec[2:3, 0:H]
            ln1g = vec[3:4, 0:H]
            ln1b = vec[4:5, 0:H]
            ln2g = vec[5:6, 0:H]
            ln2b = vec[6:7, 0:H]
            bpj = vec[7:8, 0:H]

            wattn = wattn_ref[l]                    # (H, 4H) = [Wq*s | Wk | Wv | Wo]
            wqkv = wattn[:, 0:3 * H]                # (H, 3H)
            wo = wattn[:, 3 * H:4 * H]              # (H, H)

            # fused QKV projection: one lane-dense matmul (scale folded into Wq/bq)
            qkv = jnp.dot(x, wqkv, preferred_element_type=jnp.float32) + bqkv   # (BS, 3H)

            # per-head attention (NH=4, statically unrolled; plain 2-D ops only)
            ctx_heads = []
            for h in range(NH):
                qh = qkv[:, h * dh:(h + 1) * dh]                     # (BS, dh)
                kh = qkv[:, H + h * dh:H + (h + 1) * dh]
                vh = qkv[:, 2 * H + h * dh:2 * H + (h + 1) * dh]
                s = lax.dot_general(qh, kh,
                                    dimension_numbers=(((1,), (1,)), ((), ())),
                                    preferred_element_type=jnp.float32) + bias  # (BS, BS)
                s = s - jnp.max(s, axis=-1, keepdims=True)
                p = jnp.exp(s)
                p = p / jnp.sum(p, axis=-1, keepdims=True)           # exact divide
                ctx_heads.append(jnp.dot(p, vh, preferred_element_type=jnp.float32))
            ctx = jnp.concatenate(ctx_heads, axis=-1)                # (BS, H)

            # single dense output projection (contraction = H)
            attn = jnp.dot(ctx, wo, preferred_element_type=jnp.float32) + bo

            # post-LN block: LN(x + attn) -> MLP(gelu_new) -> LN(n + mlp)
            n = _layernorm(x + attn, ln1g, ln1b)
            wfc = wmlp_ref[2 * l]                   # (H, 4H)
            wpjT = wmlp_ref[2 * l + 1]              # (H, 4H)  (= Wpj transposed)
            mid = _gelu_new(jnp.dot(n, wfc, preferred_element_type=jnp.float32) + bfc)
            m = lax.dot_general(mid, wpjT,
                                dimension_numbers=(((1,), (1,)), ((), ())),
                                preferred_element_type=jnp.float32) + bpj
            x = _layernorm(n + m, ln2g, ln2b)

        top_ref[...] = x                            # last hidden state (BS, H)

    return kernel


# ---------------- one-time weight packing (outside the jitted forward) ----------------
def pack_params(params):
    """Pack standard-layout weights into lane-dense, layer-stacked kernel arrays."""
    H = HIDDEN
    scale = 1.0 / float(DH) ** 0.5
    wattn, wmlp, vecs = [], [], []
    for lp in params["layers"]:
        wqkv = lp["wqkv"].at[:, :H].multiply(scale)      # fold 1/sqrt(dh) into Wq ...
        bqkv = lp["bqkv"].at[:, :H].multiply(scale)      # ... and into bq
        wattn.append(jnp.concatenate([wqkv, lp["wo"]], axis=1))        # (H, 4H)
        wmlp.append(lp["wfc"])                                          # (H, 4H)
        wmlp.append(lp["wpj"].T)                                        # (H, 4H)
        rows = jnp.zeros((8, 4 * H), jnp.float32)        # all per-layer vectors, one slab
        rows = rows.at[0, 0:3 * H].set(bqkv[0])
        rows = rows.at[1, 0:4 * H].set(lp["bfc"][0])
        rows = rows.at[2, 0:H].set(lp["bo"][0])
        rows = rows.at[3, 0:H].set(lp["ln1g"][0])
        rows = rows.at[4, 0:H].set(lp["ln1b"][0])
        rows = rows.at[5, 0:H].set(lp["ln2g"][0])
        rows = rows.at[6, 0:H].set(lp["ln2b"][0])
        rows = rows.at[7, 0:H].set(lp["bpj"][0])
        vecs.append(rows)
    return {
        "wte": params["wte"],               # (VOCAB, H)
        "wpe": params["wpe"],               # (N_POS, H)
        "wattn": jnp.stack(wattn),          # (N_LAYER, H, 4H)
        "wmlp": jnp.stack(wmlp),            # (2*N_LAYER, H, 4H)
        "vecs": jnp.stack(vecs),            # (N_LAYER, 8, 4H)
    }


# ---------------- module forward (single fused pallas_call) ----------------
def openai_gpt_embedder_forward(raw_ids, packed, output_mode="top"):
    B, S = raw_ids.shape
    assert S <= N_POS, "input length exceeds position embedding capacity"
    H = HIDDEN
    BS = B * S
    if output_mode not in ("none", "top", "only", "cat"):
        # TODO(synk): output_mode="mix" (ScalarMix over layers) not implemented.
        raise NotImplementedError(f"output_mode={output_mode} not supported.")
    need_lex = output_mode in ("only", "cat")

    # input_mask needs only the raw ids -> computed in the wrapper, not the kernel.
    input_mask = (raw_ids != 0).astype(jnp.int32)

    # layout plumbing: row-major (b, s) ordering of the whole batch
    raw_row = raw_ids.reshape(1, BS).astype(jnp.int32)
    pos_rows = jnp.tile(packed["wpe"][:S], (B, 1))                       # (BS, H)

    # additive attention bias (causal within each sequence, -inf across sequences);
    # depends only on static (B, S) -> constant-folded under jit, reused by every layer.
    r = jnp.arange(BS)[:, None]
    c = jnp.arange(BS)[None, :]
    allowed = (r // S == c // S) & ((c % S) <= (r % S))
    attn_bias = jnp.where(allowed, 0.0, NEG_INF).astype(jnp.float32)     # (BS, BS)

    vmem = pl.BlockSpec(memory_space=pltpu.MemorySpace.VMEM)             # whole array, VMEM
    out_shape = [jax.ShapeDtypeStruct((BS, H), jnp.float32)]             # top hidden state
    if need_lex:
        out_shape.append(jax.ShapeDtypeStruct((BS, H), jnp.float32))     # lex_seq

    outs = pl.pallas_call(
        _make_gpt_kernel(need_lex),
        in_specs=[vmem] * 7,
        out_specs=tuple([vmem] * len(out_shape)),
        out_shape=tuple(out_shape),
    )(raw_row, packed["wte"], pos_rows, attn_bias,
      packed["wattn"], packed["wmlp"], packed["vecs"])

    top = outs[0].reshape(B, S, H)

    # prepare_output (max_layer == num_layers)
    if output_mode in ("none", "top"):
        out = top
    elif output_mode == "only":
        out = outs[1].reshape(B, S, H)
    else:  # "cat"
        out = jnp.concatenate([top, outs[1].reshape(B, S, H)], axis=2)
    return out, input_mask


# ---------------- deterministic synthetic parameters (standard layout) ----------------
def init_params(key):
    def nrm(k, shape, scale=0.02):
        return scale * jax.random.normal(k, shape, dtype=jnp.float32)

    keys = jax.random.split(key, 2 + N_LAYER)
    params = {"wte": nrm(keys[0], (VOCAB, HIDDEN)),
              "wpe": nrm(keys[1], (N_POS, HIDDEN)),
              "layers": []}
    H = HIDDEN
    for i in range(N_LAYER):
        ks = jax.random.split(keys[2 + i], 12)
        params["layers"].append({
            "wqkv": nrm(ks[0], (H, 3 * H)),
            "bqkv": nrm(ks[1], (1, 3 * H)),
            "wo":   nrm(ks[2], (H, H)),
            "bo":   nrm(ks[3], (1, H)),
            "ln1g": 1.0 + 0.1 * jax.random.normal(ks[4], (1, H), jnp.float32),
            "ln1b": 0.1 * jax.random.normal(ks[5], (1, H), jnp.float32),
            "wfc":  nrm(ks[6], (H, 4 * H)),
            "bfc":  nrm(ks[7], (1, 4 * H)),
            "wpj":  nrm(ks[8], (4 * H, H)),
            "bpj":  nrm(ks[9], (1, H)),
            "ln2g": 1.0 + 0.1 * jax.random.normal(ks[10], (1, H), jnp.float32),
            "ln2b": 0.1 * jax.random.normal(ks[11], (1, H), jnp.float32),
        })
    return params


# ---------------- plain-JAX reference (for correctness check) ----------------
def _ref_block_2d(x, lp):
    S, H = x.shape
    dh = H // N_HEAD
    qkv = x @ lp["wqkv"] + lp["bqkv"]
    q, k, v = qkv[:, :H], qkv[:, H:2 * H], qkv[:, 2 * H:]
    causal = jnp.tril(jnp.ones((S, S), bool))
    heads = []
    for h in range(N_HEAD):
        qh, kh, vh = (q[:, h * dh:(h + 1) * dh], k[:, h * dh:(h + 1) * dh],
                      v[:, h * dh:(h + 1) * dh])
        s = (qh @ kh.T) / jnp.sqrt(jnp.float32(dh))
        s = jnp.where(causal, s, NEG_INF)
        s = s - s.max(-1, keepdims=True)
        p = jnp.exp(s)
        p = p / p.sum(-1, keepdims=True)
        heads.append(p @ vh)
    ctx = jnp.concatenate(heads, -1)
    a = ctx @ lp["wo"] + lp["bo"]

    def ln(z, g, b):
        mu = z.mean(-1, keepdims=True)
        var = ((z - mu) ** 2).mean(-1, keepdims=True)
        return (z - mu) / jnp.sqrt(var + LN_EPS) * g + b

    n = ln(x + a, lp["ln1g"], lp["ln1b"])
    mid = _gelu_new(n @ lp["wfc"] + lp["bfc"])
    m = mid @ lp["wpj"] + lp["bpj"]
    return ln(n + m, lp["ln2g"], lp["ln2b"])


def ref_forward(raw_ids, params):
    pad_m = (raw_ids == 0).astype(jnp.int32)
    unk_m = (raw_ids == 1).astype(jnp.int32)
    valid_m = (raw_ids > 1).astype(jnp.int32)
    ids = (raw_ids - 2) * valid_m + PAD_ID * pad_m + UNK_ID * unk_m
    mask = (raw_ids != 0).astype(jnp.int32)
    B, S = ids.shape
    x = params["wte"][ids] + params["wpe"][:S][None]
    outs = []
    for b in range(B):
        h = x[b]
        for lp in params["layers"]:
            h = _ref_block_2d(h, lp)
        outs.append(h)
    return jnp.stack(outs, 0), mask


# ---------------- main ----------------
if __name__ == "__main__":
    key = jax.random.PRNGKey(0)
    k_ids, k_params = jax.random.split(key)

    B, S = 2, 8
    # AllenNLP-style raw ids: 0 = @@PADDING@@, 1 = @@UNKNOWN@@, >=2 real tokens
    raw_ids = jax.random.randint(k_ids, (B, S), 2, VOCAB + 2, dtype=jnp.int32)
    raw_ids = raw_ids.at[0, -2:].set(0).at[1, 3].set(1)

    params = init_params(k_params)
    packed = pack_params(params)        # pack ONCE, outside the jitted forward

    fwd = jax.jit(openai_gpt_embedder_forward, static_argnames=("output_mode",))
    out, input_mask = fwd(raw_ids, packed, output_mode="top")
    out = jax.block_until_ready(out)
    input_mask = jax.block_until_ready(input_mask)

    ref_out, ref_mask = ref_forward(raw_ids, params)

    assert out.shape == (B, S, HIDDEN) and out.dtype == jnp.float32
    assert input_mask.shape == (B, S)
    assert bool(jnp.all(input_mask == ref_mask))
    assert bool(jnp.allclose(out, ref_out, rtol=5e-2, atol=5e-2)), (
        f"max abs diff {float(jnp.max(jnp.abs(out - ref_out)))}")

    print("KERNEL_OK")
</pallas_src>

<mosaic_0001>
module attributes {stable_mosaic.version = 11 : i64} {
  func.func @kernel(%arg0: memref<1x16xi32, #tpu.memory_space<vmem>>, %arg1: memref<64x32xf32, #tpu.memory_space<vmem>>, %arg2: memref<16x32xf32, #tpu.memory_space<vmem>>, %arg3: memref<16x16xf32, #tpu.memory_space<vmem>>, %arg4: memref<2x32x128xf32, #tpu.memory_space<vmem>>, %arg5: memref<4x32x128xf32, #tpu.memory_space<vmem>>, %arg6: memref<2x8x128xf32, #tpu.memory_space<vmem>>, %arg7: memref<16x32xf32, #tpu.memory_space<vmem>>) attributes {dimension_semantics = [], scalar_prefetch = 0 : i64, scratch_operands = 0 : i64, tpu.core_type = #tpu.core_type<tc>} {
    %c0 = arith.constant 0 : index
    %c0_0 = arith.constant 0 : index
    %0 = vector.load %arg0[%c0, %c0_0] : memref<1x16xi32, #tpu.memory_space<vmem>>, vector<1x16xi32>
    %c0_i32 = arith.constant 0 : i32
    %1 = vector.broadcast %c0_i32 : i32 to vector<1x16xi32>
    %2 = arith.cmpi eq, %0, %1 : vector<1x16xi32>
    %3 = arith.extui %2 : vector<1x16xi1> to vector<1x16xi32>
    %c1_i32 = arith.constant 1 : i32
    %4 = vector.broadcast %c1_i32 : i32 to vector<1x16xi32>
    %5 = arith.cmpi eq, %0, %4 : vector<1x16xi32>
    %6 = arith.extui %5 : vector<1x16xi1> to vector<1x16xi32>
    %c1_i32_1 = arith.constant 1 : i32
    %7 = vector.broadcast %c1_i32_1 : i32 to vector<1x16xi32>
    %8 = arith.cmpi sgt, %0, %7 : vector<1x16xi32>
    %9 = arith.extui %8 : vector<1x16xi1> to vector<1x16xi32>
    %c2_i32 = arith.constant 2 : i32
    %10 = vector.broadcast %c2_i32 : i32 to vector<1x16xi32>
    %11 = arith.subi %0, %10 : vector<1x16xi32>
    %12 = arith.muli %11, %9 : vector<1x16xi32>
    %c3_i32 = arith.constant 3 : i32
    %13 = vector.broadcast %c3_i32 : i32 to vector<1x16xi32>
    %14 = arith.muli %13, %3 : vector<1x16xi32>
    %15 = arith.addi %12, %14 : vector<1x16xi32>
    %c5_i32 = arith.constant 5 : i32
    %16 = vector.broadcast %c5_i32 : i32 to vector<1x16xi32>
    %17 = arith.muli %16, %6 : vector<1x16xi32>
    %18 = arith.addi %15, %17 : vector<1x16xi32>
    %19 = tpu.iota {dimensions = array<i32: 0>} : vector<64x16xi32>
    %20 = vector.broadcast %18 : vector<1x16xi32> to vector<64x16xi32>
    %21 = arith.cmpi eq, %19, %20 : vector<64x16xi32>
    %22 = arith.extui %21 : vector<64x16xi1> to vector<64x16xi32>
    %23 = arith.sitofp %22 : vector<64x16xi32> to vector<64x16xf32>
    %c0_2 = arith.constant 0 : index
    %c0_3 = arith.constant 0 : index
    %24 = vector.load %arg1[%c0_2, %c0_3] : memref<64x32xf32, #tpu.memory_space<vmem>>, vector<64x32xf32>
    %cst = arith.constant dense<0.000000e+00> : vector<16x32xf32>
    %25 = tpu.matmul %23, %24, %cst {dimension_numbers = #tpu.dot_dimension_numbers<[0], [0], [1], [1], [0, 1, 1, 1], [], []>} : vector<64x16xf32>, vector<64x32xf32>, vector<16x32xf32> -> vector<16x32xf32>
    %c0_4 = arith.constant 0 : index
    %c0_5 = arith.constant 0 : index
    %26 = vector.load %arg2[%c0_4, %c0_5] : memref<16x32xf32, #tpu.memory_space<vmem>>, vector<16x32xf32>
    %27 = arith.addf %25, %26 : vector<16x32xf32>
    %c0_6 = arith.constant 0 : index
    %c0_7 = arith.constant 0 : index
    %28 = vector.load %arg3[%c0_6, %c0_7] : memref<16x16xf32, #tpu.memory_space<vmem>>, vector<16x16xf32>
    %c0_8 = arith.constant 0 : index
    %c0_9 = arith.constant 0 : index
    %c0_10 = arith.constant 0 : index
    %29 = vector.load %arg6[%c0_8, %c0_9, %c0_10] : memref<2x8x128xf32, #tpu.memory_space<vmem>>, vector<1x8x128xf32>
    %30 = vector.shape_cast %29 : vector<1x8x128xf32> to vector<8x128xf32>
    %31 = vector.extract_strided_slice %30 {offsets = [0, 0], sizes = [1, 96], strides = [1, 1]} : vector<8x128xf32> to vector<1x96xf32>
    %32 = vector.extract_strided_slice %30 {offsets = [1, 0], sizes = [1, 128], strides = [1, 1]} : vector<8x128xf32> to vector<1x128xf32>
    %33 = vector.extract_strided_slice %30 {offsets = [2, 0], sizes = [1, 32], strides = [1, 1]} : vector<8x128xf32> to vector<1x32xf32>
    %34 = vector.extract_strided_slice %30 {offsets = [3, 0], sizes = [1, 32], strides = [1, 1]} : vector<8x128xf32> to vector<1x32xf32>
    %35 = vector.extract_strided_slice %30 {offsets = [4, 0], sizes = [1, 32], strides = [1, 1]} : vector<8x128xf32> to vector<1x32xf32>
    %36 = vector.extract_strided_slice %30 {offsets = [5, 0], sizes = [1, 32], strides = [1, 1]} : vector<8x128xf32> to vector<1x32xf32>
    %37 = vector.extract_strided_slice %30 {offsets = [6, 0], sizes = [1, 32], strides = [1, 1]} : vector<8x128xf32> to vector<1x32xf32>
    %38 = vector.extract_strided_slice %30 {offsets = [7, 0], sizes = [1, 32], strides = [1, 1]} : vector<8x128xf32> to vector<1x32xf32>
    %c0_11 = arith.constant 0 : index
    %c0_12 = arith.constant 0 : index
    %c0_13 = arith.constant 0 : index
    %39 = vector.load %arg4[%c0_11, %c0_12, %c0_13] : memref<2x32x128xf32, #tpu.memory_space<vmem>>, vector<1x32x128xf32>
    %40 = vector.shape_cast %39 : vector<1x32x128xf32> to vector<32x128xf32>
    %41 = vector.extract_strided_slice %40 {offsets = [0, 0], sizes = [32, 96], strides = [1, 1]} : vector<32x128xf32> to vector<32x96xf32>
    %42 = vector.extract_strided_slice %40 {offsets = [0, 96], sizes = [32, 32], strides = [1, 1]} : vector<32x128xf32> to vector<32x32xf32>
    %cst_14 = arith.constant dense<0.000000e+00> : vector<16x96xf32>
    %43 = tpu.matmul %27, %41, %cst_14 {dimension_numbers = #tpu.dot_dimension_numbers<[1], [0], [0], [1], [0, 0, 1, 1], [], []>} : vector<16x32xf32>, vector<32x96xf32>, vector<16x96xf32> -> vector<16x96xf32>
    %44 = vector.broadcast %31 : vector<1x96xf32> to vector<16x96xf32>
    %45 = arith.addf %43, %44 : vector<16x96xf32>
    %46 = vector.extract_strided_slice %45 {offsets = [0, 0], sizes = [16, 8], strides = [1, 1]} : vector<16x96xf32> to vector<16x8xf32>
    %47 = vector.extract_strided_slice %45 {offsets = [0, 32], sizes = [16, 8], strides = [1, 1]} : vector<16x96xf32> to vector<16x8xf32>
    %48 = vector.extract_strided_slice %45 {offsets = [0, 64], sizes = [16, 8], strides = [1, 1]} : vector<16x96xf32> to vector<16x8xf32>
    %cst_15 = arith.constant dense<0.000000e+00> : vector<16x16xf32>
    %49 = tpu.matmul %46, %47, %cst_15 {dimension_numbers = #tpu.dot_dimension_numbers<[1], [1], [0], [0], [0, 0, 1, 0], [], []>} : vector<16x8xf32>, vector<16x8xf32>, vector<16x16xf32> -> vector<16x16xf32>
    %50 = arith.addf %49, %28 : vector<16x16xf32>
    %cst_16 = arith.constant dense<0xFF800000> : vector<16xf32>
    %51 = vector.multi_reduction <maximumf>, %50, %cst_16 [1] : vector<16x16xf32> to vector<16xf32>
    %52 = vector.shape_cast %51 : vector<16xf32> to vector<16x1xf32>
    %53 = vector.broadcast %52 : vector<16x1xf32> to vector<16x16xf32>
    %54 = arith.subf %50, %53 : vector<16x16xf32>
    %55 = math.exp %54 : vector<16x16xf32>
    %cst_17 = arith.constant dense<0.000000e+00> : vector<16xf32>
    %56 = vector.multi_reduction <add>, %55, %cst_17 [1] : vector<16x16xf32> to vector<16xf32>
    %57 = vector.shape_cast %56 : vector<16xf32> to vector<16x1xf32>
    %58 = vector.broadcast %57 : vector<16x1xf32> to vector<16x16xf32>
    %59 = arith.divf %55, %58 : vector<16x16xf32>
    %cst_18 = arith.constant dense<0.000000e+00> : vector<16x8xf32>
    %60 = tpu.matmul %59, %48, %cst_18 {dimension_numbers = #tpu.dot_dimension_numbers<[1], [0], [0], [1], [0, 0, 1, 1], [], []>} : vector<16x16xf32>, vector<16x8xf32>, vector<16x8xf32> -> vector<16x8xf32>
    %61 = vector.extract_strided_slice %45 {offsets = [0, 8], sizes = [16, 8], strides = [1, 1]} : vector<16x96xf32> to vector<16x8xf32>
    %62 = vector.extract_strided_slice %45 {offsets = [0, 40], sizes = [16, 8], strides = [1, 1]} : vector<16x96xf32> to vector<16x8xf32>
    %63 = vector.extract_strided_slice %45 {offsets = [0, 72], sizes = [16, 8], strides = [1, 1]} : vector<16x96xf32> to vector<16x8xf32>
    %cst_19 = arith.constant dense<0.000000e+00> : vector<16x16xf32>
    %64 = tpu.matmul %61, %62, %cst_19 {dimension_numbers = #tpu.dot_dimension_numbers<[1], [1], [0], [0], [0, 0, 1, 0], [], []>} : vector<16x8xf32>, vector<16x8xf32>, vector<16x16xf32> -> vector<16x16xf32>
    %65 = arith.addf %64, %28 : vector<16x16xf32>
    %cst_20 = arith.constant dense<0xFF800000> : vector<16xf32>
    %66 = vector.multi_reduction <maximumf>, %65, %cst_20 [1] : vector<16x16xf32> to vector<16xf32>
    %67 = vector.shape_cast %66 : vector<16xf32> to vector<16x1xf32>
    %68 = vector.broadcast %67 : vector<16x1xf32> to vector<16x16xf32>
    %69 = arith.subf %65, %68 : vector<16x16xf32>
    %70 = math.exp %69 : vector<16x16xf32>
    %cst_21 = arith.constant dense<0.000000e+00> : vector<16xf32>
    %71 = vector.multi_reduction <add>, %70, %cst_21 [1] : vector<16x16xf32> to vector<16xf32>
    %72 = vector.shape_cast %71 : vector<16xf32> to vector<16x1xf32>
    %73 = vector.broadcast %72 : vector<16x1xf32> to vector<16x16xf32>
    %74 = arith.divf %70, %73 : vector<16x16xf32>
    %cst_22 = arith.constant dense<0.000000e+00> : vector<16x8xf32>
    %75 = tpu.matmul %74, %63, %cst_22 {dimension_numbers = #tpu.dot_dimension_numbers<[1], [0], [0], [1], [0, 0, 1, 1], [], []>} : vector<16x16xf32>, vector<16x8xf32>, vector<16x8xf32> -> vector<16x8xf32>
    %76 = vector.extract_strided_slice %45 {offsets = [0, 16], sizes = [16, 8], strides = [1, 1]} : vector<16x96xf32> to vector<16x8xf32>
    %77 = vector.extract_strided_slice %45 {offsets = [0, 48], sizes = [16, 8], strides = [1, 1]} : vector<16x96xf32> to vector<16x8xf32>
    %78 = vector.extract_strided_slice %45 {offsets = [0, 80], sizes = [16, 8], strides = [1, 1]} : vector<16x96xf32> to vector<16x8xf32>
    %cst_23 = arith.constant dense<0.000000e+00> : vector<16x16xf32>
    %79 = tpu.matmul %76, %77, %cst_23 {dimension_numbers = #tpu.dot_dimension_numbers<[1], [1], [0], [0], [0, 0, 1, 0], [], []>} : vector<16x8xf32>, vector<16x8xf32>, vector<16x16xf32> -> vector<16x16xf32>
    %80 = arith.addf %79, %28 : vector<16x16xf32>
    %cst_24 = arith.constant dense<0xFF800000> : vector<16xf32>
    %81 = vector.multi_reduction <maximumf>, %80, %cst_24 [1] : vector<16x16xf32> to vector<16xf32>
    %82 = vector.shape_cast %81 : vector<16xf32> to vector<16x1xf32>
    %83 = vector.broadcast %82 : vector<16x1xf32> to vector<16x16xf32>
    %84 = arith.subf %80, %83 : vector<16x16xf32>
    %85 = math.exp %84 : vector<16x16xf32>
    %cst_25 = arith.constant dense<0.000000e+00> : vector<16xf32>
    %86 = vector.multi_reduction <add>, %85, %cst_25 [1] : vector<16x16xf32> to vector<16xf32>
    %87 = vector.shape_cast %86 : vector<16xf32> to vector<16x1xf32>
    %88 = vector.broadcast %87 : vector<16x1xf32> to vector<16x16xf32>
    %89 = arith.divf %85, %88 : vector<16x16xf32>
    %cst_26 = arith.constant dense<0.000000e+00> : vector<16x8xf32>
    %90 = tpu.matmul %89, %78, %cst_26 {dimension_numbers = #tpu.dot_dimension_numbers<[1], [0], [0], [1], [0, 0, 1, 1], [], []>} : vector<16x16xf32>, vector<16x8xf32>, vector<16x8xf32> -> vector<16x8xf32>
    %91 = vector.extract_strided_slice %45 {offsets = [0, 24], sizes = [16, 8], strides = [1, 1]} : vector<16x96xf32> to vector<16x8xf32>
    %92 = vector.extract_strided_slice %45 {offsets = [0, 56], sizes = [16, 8], strides = [1, 1]} : vector<16x96xf32> to vector<16x8xf32>
    %93 = vector.extract_strided_slice %45 {offsets = [0, 88], sizes = [16, 8], strides = [1, 1]} : vector<16x96xf32> to vector<16x8xf32>
    %cst_27 = arith.constant dense<0.000000e+00> : vector<16x16xf32>
    %94 = tpu.matmul %91, %92, %cst_27 {dimension_numbers = #tpu.dot_dimension_numbers<[1], [1], [0], [0], [0, 0, 1, 0], [], []>} : vector<16x8xf32>, vector<16x8xf32>, vector<16x16xf32> -> vector<16x16xf32>
    %95 = arith.addf %94, %28 : vector<16x16xf32>
    %cst_28 = arith.constant dense<0xFF800000> : vector<16xf32>
    %96 = vector.multi_reduction <maximumf>, %95, %cst_28 [1] : vector<16x16xf32> to vector<16xf32>
    %97 = vector.shape_cast %96 : vector<16xf32> to vector<16x1xf32>
    %98 = vector.broadcast %97 : vector<16x1xf32> to vector<16x16xf32>
    %99 = arith.subf %95, %98 : vector<16x16xf32>
    %100 = math.exp %99 : vector<16x16xf32>
    %cst_29 = arith.constant dense<0.000000e+00> : vector<16xf32>
    %101 = vector.multi_reduction <add>, %100, %cst_29 [1] : vector<16x16xf32> to vector<16xf32>
    %102 = vector.shape_cast %101 : vector<16xf32> to vector<16x1xf32>
    %103 = vector.broadcast %102 : vector<16x1xf32> to vector<16x16xf32>
    %104 = arith.divf %100, %103 : vector<16x16xf32>
    %cst_30 = arith.constant dense<0.000000e+00> : vector<16x8xf32>
    %105 = tpu.matmul %104, %93, %cst_30 {dimension_numbers = #tpu.dot_dimension_numbers<[1], [0], [0], [1], [0, 0, 1, 1], [], []>} : vector<16x16xf32>, vector<16x8xf32>, vector<16x8xf32> -> vector<16x8xf32>
    %106 = tpu.concatenate %60, %75, %90, %105 in 1 : vector<16x8xf32>, vector<16x8xf32>, vector<16x8xf32>, vector<16x8xf32> -> vector<16x32xf32>
    %cst_31 = arith.constant dense<0.000000e+00> : vector<16x32xf32>
    %107 = tpu.matmul %106, %42, %cst_31 {dimension_numbers = #tpu.dot_dimension_numbers<[1], [0], [0], [1], [0, 0, 1, 1], [], []>} : vector<16x32xf32>, vector<32x32xf32>, vector<16x32xf32> -> vector<16x32xf32>
    %108 = vector.broadcast %33 : vector<1x32xf32> to vector<16x32xf32>
    %109 = arith.addf %107, %108 : vector<16x32xf32>
    %110 = arith.addf %27, %109 : vector<16x32xf32>
    %cst_32 = arith.constant dense<0.000000e+00> : vector<16xf32>
    %111 = vector.multi_reduction <add>, %110, %cst_32 [1] : vector<16x32xf32> to vector<16xf32>
    %112 = vector.shape_cast %111 : vector<16xf32> to vector<16x1xf32>
    %cst_33 = arith.constant 3.200000e+01 : f32
    %113 = vector.broadcast %cst_33 : f32 to vector<16x1xf32>
    %114 = arith.divf %112, %113 : vector<16x1xf32>
    %115 = vector.broadcast %114 : vector<16x1xf32> to vector<16x32xf32>
    %116 = arith.subf %110, %115 : vector<16x32xf32>
    %117 = arith.mulf %116, %116 : vector<16x32xf32>
    %cst_34 = arith.constant dense<0.000000e+00> : vector<16xf32>
    %118 = vector.multi_reduction <add>, %117, %cst_34 [1] : vector<16x32xf32> to vector<16xf32>
    %119 = vector.shape_cast %118 : vector<16xf32> to vector<16x1xf32>
    %cst_35 = arith.constant 3.200000e+01 : f32
    %120 = vector.broadcast %cst_35 : f32 to vector<16x1xf32>
    %121 = arith.divf %119, %120 : vector<16x1xf32>
    %122 = vector.broadcast %114 : vector<16x1xf32> to vector<16x32xf32>
    %123 = arith.subf %110, %122 : vector<16x32xf32>
    %cst_36 = arith.constant 9.99999974E-6 : f32
    %124 = vector.broadcast %cst_36 : f32 to vector<16x1xf32>
    %125 = arith.addf %121, %124 : vector<16x1xf32>
    %126 = math.rsqrt %125 : vector<16x1xf32>
    %127 = vector.broadcast %126 : vector<16x1xf32> to vector<16x32xf32>
    %128 = arith.mulf %123, %127 : vector<16x32xf32>
    %129 = vector.broadcast %34 : vector<1x32xf32> to vector<16x32xf32>
    %130 = arith.mulf %128, %129 : vector<16x32xf32>
    %131 = vector.broadcast %35 : vector<1x32xf32> to vector<16x32xf32>
    %132 = arith.addf %130, %131 : vector<16x32xf32>
    %c0_37 = arith.constant 0 : index
    %c0_38 = arith.constant 0 : index
    %c0_39 = arith.constant 0 : index
    %133 = vector.load %arg5[%c0_37, %c0_38, %c0_39] : memref<4x32x128xf32, #tpu.memory_space<vmem>>, vector<1x32x128xf32>
    %134 = vector.shape_cast %133 : vector<1x32x128xf32> to vector<32x128xf32>
    %c1 = arith.constant 1 : index
    %c0_40 = arith.constant 0 : index
    %c0_41 = arith.constant 0 : index
    %135 = vector.load %arg5[%c1, %c0_40, %c0_41] : memref<4x32x128xf32, #tpu.memory_space<vmem>>, vector<1x32x128xf32>
    %136 = vector.shape_cast %135 : vector<1x32x128xf32> to vector<32x128xf32>
    %cst_42 = arith.constant dense<0.000000e+00> : vector<16x128xf32>
    %137 = tpu.matmul %132, %134, %cst_42 {dimension_numbers = #tpu.dot_dimension_numbers<[1], [0], [0], [1], [0, 0, 1, 1], [], []>} : vector<16x32xf32>, vector<32x128xf32>, vector<16x128xf32> -> vector<16x128xf32>
    %138 = vector.broadcast %32 : vector<1x128xf32> to vector<16x128xf32>
    %139 = arith.addf %137, %138 : vector<16x128xf32>
    %cst_43 = arith.constant 5.000000e-01 : f32
    %140 = vector.broadcast %cst_43 : f32 to vector<16x128xf32>
    %141 = arith.mulf %140, %139 : vector<16x128xf32>
    %cst_44 = arith.constant 0.636619746 : f32
    %142 = math.sqrt %cst_44 : f32
    %cst_45 = arith.constant 4.471500e-02 : f32
    %143 = vector.broadcast %cst_45 : f32 to vector<16x128xf32>
    %144 = arith.mulf %143, %139 : vector<16x128xf32>
    %145 = arith.mulf %144, %139 : vector<16x128xf32>
    %146 = arith.mulf %145, %139 : vector<16x128xf32>
    %147 = arith.addf %139, %146 : vector<16x128xf32>
    %148 = vector.broadcast %142 : f32 to vector<16x128xf32>
    %149 = arith.mulf %148, %147 : vector<16x128xf32>
    %150 = math.tanh %149 : vector<16x128xf32>
    %cst_46 = arith.constant 1.000000e+00 : f32
    %151 = vector.broadcast %cst_46 : f32 to vector<16x128xf32>
    %152 = arith.addf %151, %150 : vector<16x128xf32>
    %153 = arith.mulf %141, %152 : vector<16x128xf32>
    %cst_47 = arith.constant dense<0.000000e+00> : vector<16x32xf32>
    %154 = tpu.matmul %153, %136, %cst_47 {dimension_numbers = #tpu.dot_dimension_numbers<[1], [1], [0], [0], [0, 0, 1, 0], [], []>} : vector<16x128xf32>, vector<32x128xf32>, vector<16x32xf32> -> vector<16x32xf32>
    %155 = vector.broadcast %38 : vector<1x32xf32> to vector<16x32xf32>
    %156 = arith.addf %154, %155 : vector<16x32xf32>
    %157 = arith.addf %132, %156 : vector<16x32xf32>
    %cst_48 = arith.constant dense<0.000000e+00> : vector<16xf32>
    %158 = vector.multi_reduction <add>, %157, %cst_48 [1] : vector<16x32xf32> to vector<16xf32>
    %159 = vector.shape_cast %158 : vector<16xf32> to vector<16x1xf32>
    %cst_49 = arith.constant 3.200000e+01 : f32
    %160 = vector.broadcast %cst_49 : f32 to vector<16x1xf32>
    %161 = arith.divf %159, %160 : vector<16x1xf32>
    %162 = vector.broadcast %161 : vector<16x1xf32> to vector<16x32xf32>
    %163 = arith.subf %157, %162 : vector<16x32xf32>
    %164 = arith.mulf %163, %163 : vector<16x32xf32>
    %cst_50 = arith.constant dense<0.000000e+00> : vector<16xf32>
    %165 = vector.multi_reduction <add>, %164, %cst_50 [1] : vector<16x32xf32> to vector<16xf32>
    %166 = vector.shape_cast %165 : vector<16xf32> to vector<16x1xf32>
    %cst_51 = arith.constant 3.200000e+01 : f32
    %167 = vector.broadcast %cst_51 : f32 to vector<16x1xf32>
    %168 = arith.divf %166, %167 : vector<16x1xf32>
    %169 = vector.broadcast %161 : vector<16x1xf32> to vector<16x32xf32>
    %170 = arith.subf %157, %169 : vector<16x32xf32>
    %cst_52 = arith.constant 9.99999974E-6 : f32
    %171 = vector.broadcast %cst_52 : f32 to vector<16x1xf32>
    %172 = arith.addf %168, %171 : vector<16x1xf32>
    %173 = math.rsqrt %172 : vector<16x1xf32>
    %174 = vector.broadcast %173 : vector<16x1xf32> to vector<16x32xf32>
    %175 = arith.mulf %170, %174 : vector<16x32xf32>
    %176 = vector.broadcast %36 : vector<1x32xf32> to vector<16x32xf32>
    %177 = arith.mulf %175, %176 : vector<16x32xf32>
    %178 = vector.broadcast %37 : vector<1x32xf32> to vector<16x32xf32>
    %179 = arith.addf %177, %178 : vector<16x32xf32>
    %c1_53 = arith.constant 1 : index
    %c0_54 = arith.constant 0 : index
    %c0_55 = arith.constant 0 : index
    %180 = vector.load %arg6[%c1_53, %c0_54, %c0_55] : memref<2x8x128xf32, #tpu.memory_space<vmem>>, vector<1x8x128xf32>
    %181 = vector.shape_cast %180 : vector<1x8x128xf32> to vector<8x128xf32>
    %182 = vector.extract_strided_slice %181 {offsets = [0, 0], sizes = [1, 96], strides = [1, 1]} : vector<8x128xf32> to vector<1x96xf32>
    %183 = vector.extract_strided_slice %181 {offsets = [1, 0], sizes = [1, 128], strides = [1, 1]} : vector<8x128xf32> to vector<1x128xf32>
    %184 = vector.extract_strided_slice %181 {offsets = [2, 0], sizes = [1, 32], strides = [1, 1]} : vector<8x128xf32> to vector<1x32xf32>
    %185 = vector.extract_strided_slice %181 {offsets = [3, 0], sizes = [1, 32], strides = [1, 1]} : vector<8x128xf32> to vector<1x32xf32>
    %186 = vector.extract_strided_slice %181 {offsets = [4, 0], sizes = [1, 32], strides = [1, 1]} : vector<8x128xf32> to vector<1x32xf32>
    %187 = vector.extract_strided_slice %181 {offsets = [5, 0], sizes = [1, 32], strides = [1, 1]} : vector<8x128xf32> to vector<1x32xf32>
    %188 = vector.extract_strided_slice %181 {offsets = [6, 0], sizes = [1, 32], strides = [1, 1]} : vector<8x128xf32> to vector<1x32xf32>
    %189 = vector.extract_strided_slice %181 {offsets = [7, 0], sizes = [1, 32], strides = [1, 1]} : vector<8x128xf32> to vector<1x32xf32>
    %c1_56 = arith.constant 1 : index
    %c0_57 = arith.constant 0 : index
    %c0_58 = arith.constant 0 : index
    %190 = vector.load %arg4[%c1_56, %c0_57, %c0_58] : memref<2x32x128xf32, #tpu.memory_space<vmem>>, vector<1x32x128xf32>
    %191 = vector.shape_cast %190 : vector<1x32x128xf32> to vector<32x128xf32>
    %192 = vector.extract_strided_slice %191 {offsets = [0, 0], sizes = [32, 96], strides = [1, 1]} : vector<32x128xf32> to vector<32x96xf32>
    %193 = vector.extract_strided_slice %191 {offsets = [0, 96], sizes = [32, 32], strides = [1, 1]} : vector<32x128xf32> to vector<32x32xf32>
    %cst_59 = arith.constant dense<0.000000e+00> : vector<16x96xf32>
    %194 = tpu.matmul %179, %192, %cst_59 {dimension_numbers = #tpu.dot_dimension_numbers<[1], [0], [0], [1], [0, 0, 1, 1], [], []>} : vector<16x32xf32>, vector<32x96xf32>, vector<16x96xf32> -> vector<16x96xf32>
    %195 = vector.broadcast %182 : vector<1x96xf32> to vector<16x96xf32>
    %196 = arith.addf %194, %195 : vector<16x96xf32>
    %197 = vector.extract_strided_slice %196 {offsets = [0, 0], sizes = [16, 8], strides = [1, 1]} : vector<16x96xf32> to vector<16x8xf32>
    %198 = vector.extract_strided_slice %196 {offsets = [0, 32], sizes = [16, 8], strides = [1, 1]} : vector<16x96xf32> to vector<16x8xf32>
    %199 = vector.extract_strided_slice %196 {offsets = [0, 64], sizes = [16, 8], strides = [1, 1]} : vector<16x96xf32> to vector<16x8xf32>
    %cst_60 = arith.constant dense<0.000000e+00> : vector<16x16xf32>
    %200 = tpu.matmul %197, %198, %cst_60 {dimension_numbers = #tpu.dot_dimension_numbers<[1], [1], [0], [0], [0, 0, 1, 0], [], []>} : vector<16x8xf32>, vector<16x8xf32>, vector<16x16xf32> -> vector<16x16xf32>
    %201 = arith.addf %200, %28 : vector<16x16xf32>
    %cst_61 = arith.constant dense<0xFF800000> : vector<16xf32>
    %202 = vector.multi_reduction <maximumf>, %201, %cst_61 [1] : vector<16x16xf32> to vector<16xf32>
    %203 = vector.shape_cast %202 : vector<16xf32> to vector<16x1xf32>
    %204 = vector.broadcast %203 : vector<16x1xf32> to vector<16x16xf32>
    %205 = arith.subf %201, %204 : vector<16x16xf32>
    %206 = math.exp %205 : vector<16x16xf32>
    %cst_62 = arith.constant dense<0.000000e+00> : vector<16xf32>
    %207 = vector.multi_reduction <add>, %206, %cst_62 [1] : vector<16x16xf32> to vector<16xf32>
    %208 = vector.shape_cast %207 : vector<16xf32> to vector<16x1xf32>
    %209 = vector.broadcast %208 : vector<16x1xf32> to vector<16x16xf32>
    %210 = arith.divf %206, %209 : vector<16x16xf32>
    %cst_63 = arith.constant dense<0.000000e+00> : vector<16x8xf32>
    %211 = tpu.matmul %210, %199, %cst_63 {dimension_numbers = #tpu.dot_dimension_numbers<[1], [0], [0], [1], [0, 0, 1, 1], [], []>} : vector<16x16xf32>, vector<16x8xf32>, vector<16x8xf32> -> vector<16x8xf32>
    %212 = vector.extract_strided_slice %196 {offsets = [0, 8], sizes = [16, 8], strides = [1, 1]} : vector<16x96xf32> to vector<16x8xf32>
    %213 = vector.extract_strided_slice %196 {offsets = [0, 40], sizes = [16, 8], strides = [1, 1]} : vector<16x96xf32> to vector<16x8xf32>
    %214 = vector.extract_strided_slice %196 {offsets = [0, 72], sizes = [16, 8], strides = [1, 1]} : vector<16x96xf32> to vector<16x8xf32>
    %cst_64 = arith.constant dense<0.000000e+00> : vector<16x16xf32>
    %215 = tpu.matmul %212, %213, %cst_64 {dimension_numbers = #tpu.dot_dimension_numbers<[1], [1], [0], [0], [0, 0, 1, 0], [], []>} : vector<16x8xf32>, vector<16x8xf32>, vector<16x16xf32> -> vector<16x16xf32>
    %216 = arith.addf %215, %28 : vector<16x16xf32>
    %cst_65 = arith.constant dense<0xFF800000> : vector<16xf32>
    %217 = vector.multi_reduction <maximumf>, %216, %cst_65 [1] : vector<16x16xf32> to vector<16xf32>
    %218 = vector.shape_cast %217 : vector<16xf32> to vector<16x1xf32>
    %219 = vector.broadcast %218 : vector<16x1xf32> to vector<16x16xf32>
    %220 = arith.subf %216, %219 : vector<16x16xf32>
    %221 = math.exp %220 : vector<16x16xf32>
    %cst_66 = arith.constant dense<0.000000e+00> : vector<16xf32>
    %222 = vector.multi_reduction <add>, %221, %cst_66 [1] : vector<16x16xf32> to vector<16xf32>
    %223 = vector.shape_cast %222 : vector<16xf32> to vector<16x1xf32>
    %224 = vector.broadcast %223 : vector<16x1xf32> to vector<16x16xf32>
    %225 = arith.divf %221, %224 : vector<16x16xf32>
    %cst_67 = arith.constant dense<0.000000e+00> : vector<16x8xf32>
    %226 = tpu.matmul %225, %214, %cst_67 {dimension_numbers = #tpu.dot_dimension_numbers<[1], [0], [0], [1], [0, 0, 1, 1], [], []>} : vector<16x16xf32>, vector<16x8xf32>, vector<16x8xf32> -> vector<16x8xf32>
    %227 = vector.extract_strided_slice %196 {offsets = [0, 16], sizes = [16, 8], strides = [1, 1]} : vector<16x96xf32> to vector<16x8xf32>
    %228 = vector.extract_strided_slice %196 {offsets = [0, 48], sizes = [16, 8], strides = [1, 1]} : vector<16x96xf32> to vector<16x8xf32>
    %229 = vector.extract_strided_slice %196 {offsets = [0, 80], sizes = [16, 8], strides = [1, 1]} : vector<16x96xf32> to vector<16x8xf32>
    %cst_68 = arith.constant dense<0.000000e+00> : vector<16x16xf32>
    %230 = tpu.matmul %227, %228, %cst_68 {dimension_numbers = #tpu.dot_dimension_numbers<[1], [1], [0], [0], [0, 0, 1, 0], [], []>} : vector<16x8xf32>, vector<16x8xf32>, vector<16x16xf32> -> vector<16x16xf32>
    %231 = arith.addf %230, %28 : vector<16x16xf32>
    %cst_69 = arith.constant dense<0xFF800000> : vector<16xf32>
    %232 = vector.multi_reduction <maximumf>, %231, %cst_69 [1] : vector<16x16xf32> to vector<16xf32>
    %233 = vector.shape_cast %232 : vector<16xf32> to vector<16x1xf32>
    %234 = vector.broadcast %233 : vector<16x1xf32> to vector<16x16xf32>
    %235 = arith.subf %231, %234 : vector<16x16xf32>
    %236 = math.exp %235 : vector<16x16xf32>
    %cst_70 = arith.constant dense<0.000000e+00> : vector<16xf32>
    %237 = vector.multi_reduction <add>, %236, %cst_70 [1] : vector<16x16xf32> to vector<16xf32>
    %238 = vector.shape_cast %237 : vector<16xf32> to vector<16x1xf32>
    %239 = vector.broadcast %238 : vector<16x1xf32> to vector<16x16xf32>
    %240 = arith.divf %236, %239 : vector<16x16xf32>
    %cst_71 = arith.constant dense<0.000000e+00> : vector<16x8xf32>
    %241 = tpu.matmul %240, %229, %cst_71 {dimension_numbers = #tpu.dot_dimension_numbers<[1], [0], [0], [1], [0, 0, 1, 1], [], []>} : vector<16x16xf32>, vector<16x8xf32>, vector<16x8xf32> -> vector<16x8xf32>
    %242 = vector.extract_strided_slice %196 {offsets = [0, 24], sizes = [16, 8], strides = [1, 1]} : vector<16x96xf32> to vector<16x8xf32>
    %243 = vector.extract_strided_slice %196 {offsets = [0, 56], sizes = [16, 8], strides = [1, 1]} : vector<16x96xf32> to vector<16x8xf32>
    %244 = vector.extract_strided_slice %196 {offsets = [0, 88], sizes = [16, 8], strides = [1, 1]} : vector<16x96xf32> to vector<16x8xf32>
    %cst_72 = arith.constant dense<0.000000e+00> : vector<16x16xf32>
    %245 = tpu.matmul %242, %243, %cst_72 {dimension_numbers = #tpu.dot_dimension_numbers<[1], [1], [0], [0], [0, 0, 1, 0], [], []>} : vector<16x8xf32>, vector<16x8xf32>, vector<16x16xf32> -> vector<16x16xf32>
    %246 = arith.addf %245, %28 : vector<16x16xf32>
    %cst_73 = arith.constant dense<0xFF800000> : vector<16xf32>
    %247 = vector.multi_reduction <maximumf>, %246, %cst_73 [1] : vector<16x16xf32> to vector<16xf32>
    %248 = vector.shape_cast %247 : vector<16xf32> to vector<16x1xf32>
    %249 = vector.broadcast %248 : vector<16x1xf32> to vector<16x16xf32>
    %250 = arith.subf %246, %249 : vector<16x16xf32>
    %251 = math.exp %250 : vector<16x16xf32>
    %cst_74 = arith.constant dense<0.000000e+00> : vector<16xf32>
    %252 = vector.multi_reduction <add>, %251, %cst_74 [1] : vector<16x16xf32> to vector<16xf32>
    %253 = vector.shape_cast %252 : vector<16xf32> to vector<16x1xf32>
    %254 = vector.broadcast %253 : vector<16x1xf32> to vector<16x16xf32>
    %255 = arith.divf %251, %254 : vector<16x16xf32>
    %cst_75 = arith.constant dense<0.000000e+00> : vector<16x8xf32>
    %256 = tpu.matmul %255, %244, %cst_75 {dimension_numbers = #tpu.dot_dimension_numbers<[1], [0], [0], [1], [0, 0, 1, 1], [], []>} : vector<16x16xf32>, vector<16x8xf32>, vector<16x8xf32> -> vector<16x8xf32>
    %257 = tpu.concatenate %211, %226, %241, %256 in 1 : vector<16x8xf32>, vector<16x8xf32>, vector<16x8xf32>, vector<16x8xf32> -> vector<16x32xf32>
    %cst_76 = arith.constant dense<0.000000e+00> : vector<16x32xf32>
    %258 = tpu.matmul %257, %193, %cst_76 {dimension_numbers = #tpu.dot_dimension_numbers<[1], [0], [0], [1], [0, 0, 1, 1], [], []>} : vector<16x32xf32>, vector<32x32xf32>, vector<16x32xf32> -> vector<16x32xf32>
    %259 = vector.broadcast %184 : vector<1x32xf32> to vector<16x32xf32>
    %260 = arith.addf %258, %259 : vector<16x32xf32>
    %261 = arith.addf %179, %260 : vector<16x32xf32>
    %cst_77 = arith.constant dense<0.000000e+00> : vector<16xf32>
    %262 = vector.multi_reduction <add>, %261, %cst_77 [1] : vector<16x32xf32> to vector<16xf32>
    %263 = vector.shape_cast %262 : vector<16xf32> to vector<16x1xf32>
    %cst_78 = arith.constant 3.200000e+01 : f32
    %264 = vector.broadcast %cst_78 : f32 to vector<16x1xf32>
    %265 = arith.divf %263, %264 : vector<16x1xf32>
    %266 = vector.broadcast %265 : vector<16x1xf32> to vector<16x32xf32>
    %267 = arith.subf %261, %266 : vector<16x32xf32>
    %268 = arith.mulf %267, %267 : vector<16x32xf32>
    %cst_79 = arith.constant dense<0.000000e+00> : vector<16xf32>
    %269 = vector.multi_reduction <add>, %268, %cst_79 [1] : vector<16x32xf32> to vector<16xf32>
    %270 = vector.shape_cast %269 : vector<16xf32> to vector<16x1xf32>
    %cst_80 = arith.constant 3.200000e+01 : f32
    %271 = vector.broadcast %cst_80 : f32 to vector<16x1xf32>
    %272 = arith.divf %270, %271 : vector<16x1xf32>
    %273 = vector.broadcast %265 : vector<16x1xf32> to vector<16x32xf32>
    %274 = arith.subf %261, %273 : vector<16x32xf32>
    %cst_81 = arith.constant 9.99999974E-6 : f32
    %275 = vector.broadcast %cst_81 : f32 to vector<16x1xf32>
    %276 = arith.addf %272, %275 : vector<16x1xf32>
    %277 = math.rsqrt %276 : vector<16x1xf32>
    %278 = vector.broadcast %277 : vector<16x1xf32> to vector<16x32xf32>
    %279 = arith.mulf %274, %278 : vector<16x32xf32>
    %280 = vector.broadcast %185 : vector<1x32xf32> to vector<16x32xf32>
    %281 = arith.mulf %279, %280 : vector<16x32xf32>
    %282 = vector.broadcast %186 : vector<1x32xf32> to vector<16x32xf32>
    %283 = arith.addf %281, %282 : vector<16x32xf32>
    %c2 = arith.constant 2 : index
    %c0_82 = arith.constant 0 : index
    %c0_83 = arith.constant 0 : index
    %284 = vector.load %arg5[%c2, %c0_82, %c0_83] : memref<4x32x128xf32, #tpu.memory_space<vmem>>, vector<1x32x128xf32>
    %285 = vector.shape_cast %284 : vector<1x32x128xf32> to vector<32x128xf32>
    %c3 = arith.constant 3 : index
    %c0_84 = arith.constant 0 : index
    %c0_85 = arith.constant 0 : index
    %286 = vector.load %arg5[%c3, %c0_84, %c0_85] : memref<4x32x128xf32, #tpu.memory_space<vmem>>, vector<1x32x128xf32>
    %287 = vector.shape_cast %286 : vector<1x32x128xf32> to vector<32x128xf32>
    %cst_86 = arith.constant dense<0.000000e+00> : vector<16x128xf32>
    %288 = tpu.matmul %283, %285, %cst_86 {dimension_numbers = #tpu.dot_dimension_numbers<[1], [0], [0], [1], [0, 0, 1, 1], [], []>} : vector<16x32xf32>, vector<32x128xf32>, vector<16x128xf32> -> vector<16x128xf32>
    %289 = vector.broadcast %183 : vector<1x128xf32> to vector<16x128xf32>
    %290 = arith.addf %288, %289 : vector<16x128xf32>
    %cst_87 = arith.constant 5.000000e-01 : f32
    %291 = vector.broadcast %cst_87 : f32 to vector<16x128xf32>
    %292 = arith.mulf %291, %290 : vector<16x128xf32>
    %cst_88 = arith.constant 0.636619746 : f32
    %293 = math.sqrt %cst_88 : f32
    %cst_89 = arith.constant 4.471500e-02 : f32
    %294 = vector.broadcast %cst_89 : f32 to vector<16x128xf32>
    %295 = arith.mulf %294, %290 : vector<16x128xf32>
    %296 = arith.mulf %295, %290 : vector<16x128xf32>
    %297 = arith.mulf %296, %290 : vector<16x128xf32>
    %298 = arith.addf %290, %297 : vector<16x128xf32>
    %299 = vector.broadcast %293 : f32 to vector<16x128xf32>
    %300 = arith.mulf %299, %298 : vector<16x128xf32>
    %301 = math.tanh %300 : vector<16x128xf32>
    %cst_90 = arith.constant 1.000000e+00 : f32
    %302 = vector.broadcast %cst_90 : f32 to vector<16x128xf32>
    %303 = arith.addf %302, %301 : vector<16x128xf32>
    %304 = arith.mulf %292, %303 : vector<16x128xf32>
    %cst_91 = arith.constant dense<0.000000e+00> : vector<16x32xf32>
    %305 = tpu.matmul %304, %287, %cst_91 {dimension_numbers = #tpu.dot_dimension_numbers<[1], [1], [0], [0], [0, 0, 1, 0], [], []>} : vector<16x128xf32>, vector<32x128xf32>, vector<16x32xf32> -> vector<16x32xf32>
    %306 = vector.broadcast %189 : vector<1x32xf32> to vector<16x32xf32>
    %307 = arith.addf %305, %306 : vector<16x32xf32>
    %308 = arith.addf %283, %307 : vector<16x32xf32>
    %cst_92 = arith.constant dense<0.000000e+00> : vector<16xf32>
    %309 = vector.multi_reduction <add>, %308, %cst_92 [1] : vector<16x32xf32> to vector<16xf32>
    %310 = vector.shape_cast %309 : vector<16xf32> to vector<16x1xf32>
    %cst_93 = arith.constant 3.200000e+01 : f32
    %311 = vector.broadcast %cst_93 : f32 to vector<16x1xf32>
    %312 = arith.divf %310, %311 : vector<16x1xf32>
    %313 = vector.broadcast %312 : vector<16x1xf32> to vector<16x32xf32>
    %314 = arith.subf %308, %313 : vector<16x32xf32>
    %315 = arith.mulf %314, %314 : vector<16x32xf32>
    %cst_94 = arith.constant dense<0.000000e+00> : vector<16xf32>
    %316 = vector.multi_reduction <add>, %315, %cst_94 [1] : vector<16x32xf32> to vector<16xf32>
    %317 = vector.shape_cast %316 : vector<16xf32> to vector<16x1xf32>
    %cst_95 = arith.constant 3.200000e+01 : f32
    %318 = vector.broadcast %cst_95 : f32 to vector<16x1xf32>
    %319 = arith.divf %317, %318 : vector<16x1xf32>
    %320 = vector.broadcast %312 : vector<16x1xf32> to vector<16x32xf32>
    %321 = arith.subf %308, %320 : vector<16x32xf32>
    %cst_96 = arith.constant 9.99999974E-6 : f32
    %322 = vector.broadcast %cst_96 : f32 to vector<16x1xf32>
    %323 = arith.addf %319, %322 : vector<16x1xf32>
    %324 = math.rsqrt %323 : vector<16x1xf32>
    %325 = vector.broadcast %324 : vector<16x1xf32> to vector<16x32xf32>
    %326 = arith.mulf %321, %325 : vector<16x32xf32>
    %327 = vector.broadcast %187 : vector<1x32xf32> to vector<16x32xf32>
    %328 = arith.mulf %326, %327 : vector<16x32xf32>
    %329 = vector.broadcast %188 : vector<1x32xf32> to vector<16x32xf32>
    %330 = arith.addf %328, %329 : vector<16x32xf32>
    %c0_97 = arith.constant 0 : index
    %c0_98 = arith.constant 0 : index
    %331 = vector.load %arg7[%c0_97, %c0_98] : memref<16x32xf32, #tpu.memory_space<vmem>>, vector<16x32xf32>
    tpu.vector_store %arg7[%c0_97, %c0_98], %330 {strides = array<i32>} : memref<16x32xf32, #tpu.memory_space<vmem>>, vector<16x32xf32>,
    return
  }
}

</mosaic_0001>

<bundles_post_ra>
// kernel: openai_gpt_embedder_forward.1
= control target key start
LH: loop header
LB: loop body
LE: loop exit
PB: predicated region body
PF: predicated region fallthrough
CT: control target
= control target key end

     0   :  { %12 = vsyncpa [#allocation3], 0  ;;  %s3994_s0 = inlined_call_operand.vmem [shape: s32[1,16], index: 0, kind: input, shape index: {}]   ;;  %s3995_s1 = inlined_call_operand.vmem [shape: f32[64,32], index: 1, kind: input, shape index: {}]   ;;  %s3996_s2 = inlined_call_operand.vmem [shape: f32[16,32], index: 2, kind: input, shape index: {}]   ;;  %s3997_s3 = inlined_call_operand.vmem [shape: f32[16,16], index: 3, kind: input, shape index: {}]   ;;  %s3998_s4 = inlined_call_operand.hbm [shape: f32[2,32,128], index: 4, kind: input, shape index: {}]   ;;  %s3999_s5 = inlined_call_operand.vmem [shape: f32[4,32,128], index: 5, kind: input, shape index: {}]   ;;  %s4000_s6 = inlined_call_operand.vmem [shape: f32[2,8,128], index: 6, kind: input, shape index: {}]   ;;  %s4001_s7 = inlined_call_operand.hbm [shape: f32[16,32], index: 7, kind: output, shape index: {}]  }
   0x1   :  { %13 = vsyncpa [#allocation4], 0  ;;  %s3403_s24 = smov [#allocation2]  }
   0x2   :  { %s27_s25 = sshll.u32 %s3403_s24, 4  ;;  %s28_s25 = int_to_ptr.vmem [resolvable:$true] %s27_s25 }
   0x3   :  { %s3367_s26 = scalar_lea.vmem %s28_s25, 1024  ;;  %p3372_p1 = scmp.lt.s32.totalorder %s28_s25, %s28_s25 }
   0x4   :  { %p3368_p0 = scmp.ne.s32.totalorder %s28_s25, %s3367_s26  ;;  %p3373_p2 = scmp.lt.s32.totalorder %s3367_s26, %s3367_s26 }
   0x6   :  { %p3374_p3 = por %p3373_p2, %p3372_p1 }
   0x8   :  { %p3375_p4 = pnand %p3374_p3, %p3368_p0 }
   0xa   :  { %3378 = shalt.err (!%p3375_p4)
}
   0xb   :  { %s3404_s27 = smov 128   ;;  %s3405_s28 = smov 8  }
   0xc   :  { %33 = dma.hbm_to_vmem [thread:$0]  %s3998_s4, 1024, %s28_s25, [#allocation3], %s3404_s27, %s3404_s27, %s3405_s28  }
   0xd   :  { %3399 = dma.done.wait [#allocation3], 1024  }
   0xe   :  { %3400 = vsyncadd [#allocation3], 4294966272  ;;  %v54_v0 = vlaneseq  ;;  %v41_v1 = vld [vmem:[%s3994_s0] sm:$0x1]  ;;  %v98_v3 = vld [vmem:[%s3995_s1 + $0x38] sm:$0xff]  ;;  %v3406_v6 = vmov 0  }
   0xf   :  { %v97_v4 = vld [vmem:[%s3995_s1 + $0x30] sm:$0xff]  ;;  %vm42_vm0 = vcmp.eq.s32.totalorder %v41_v1, 0  ;;  %vm44_vm1 = vcmp.eq.s32.totalorder %v41_v1, 1  ;;  %vm46_vm2 = vcmp.gt.s32.totalorder %v41_v1, 1  ;;  %v2824_v5 = vadd.s32 4294967294, %v41_v1  ;;  %3030 = vmatprep.subr.mxu0 %v98_v3  ;;  %v96_v10 = vld [vmem:[%s3995_s1 + $0x28] sm:$0xff] }
  0x10   :  { %v3472_v2 = vshrl.u32 %v54_v0, 7  ;;  %v43_v7 = vsel %vm42_vm0, 1, %v3406_v6  ;;  %v45_v8 = vsel %vm44_vm1, 1, %v3406_v6  ;;  %v47_v9 = vsel %vm46_vm2, 1, %v3406_v6  ;;  %3031 = vmatpush3.msra.mxu0 %v98_v3  ;;  %v95_v14 = vld [vmem:[%s3995_s1 + $0x20] sm:$0xff]  ;;  %v94_v17 = vld [vmem:[%s3995_s1 + $0x18] sm:$0xff] }
  0x11   :  { %v49_v11 = vmul.u32 %v2824_v5, %v47_v9  ;;  %v50_v12 = vmul.u32 3, %v43_v7  ;;  %3032 = vmatprep.subr.mxu0 %v97_v4  ;;  %v93_v20 = vld [vmem:[%s3995_s1 + $0x10] sm:$0xff]  ;;  %v92_v23 = vld [vmem:[%s3995_s1 + $0x8] sm:$0xff]  ;;  %v3407_v24 = vmov 0.0   ;;  %v91_v26 = vld [vmem:[%s3995_s1] sm:$0xff]  ;;  %vm133_vm11 = vcmask 523264  }
  0x12   :  { %v52_v13 = vmul.u32 5, %v45_v8  ;;  %3033 = vmatpush3.msra.mxu0 %v97_v4  ;;  %v3487_v16 = vsub.s32 0, %v3472_v2  ;;  %v56_v19 = vadd.s32 8, %v3472_v2  ;;  %v57_v22 = vadd.s32 16, %v3472_v2  ;;  %v3505_v28 = vld [vmem:[#allocation2 + $0x18] sm:$0xff]  ;;  %v3514_v42 = vld [vmem:[#allocation2 + $0x10] sm:$0xff] }
  0x13   :  { %v51_v15 = vadd.s32 %v50_v12, %v49_v11  ;;  %3034 = vmatprep.subr.mxu0 %v96_v10  ;;  %v58_v29 = vadd.s32 24, %v3472_v2  ;;  %3049 = vmatprep.subr.mxu1 %v3505_v28  ;;  %v59_v31 = vadd.s32 32, %v3472_v2  ;;  %v60_v33 = vadd.s32 40, %v3472_v2  ;;  %v3518_v43 = vld [vmem:[#allocation2 + $0x8] sm:$0xff]  ;;  %v3522_v44 = vld [vmem:[#allocation2] sm:$0xff]  ;;  %s3409_s8 = smov 112  }
  0x14   :  { %3035 = vmatpush3.msra.mxu0 %v96_v10  ;;  %3050 = vmatpush3.msra.mxu1 %v3505_v28  ;;  %v61_v35 = vadd.s32 48, %v3472_v2  ;;  %v62_v37 = vadd.s32 56, %v3472_v2  ;;  %v99_v46 = vld [vmem:[%s3996_s2] sm:$0xff]  ;;  %v100_v47 = vld [vmem:[%s3996_s2 + $0x8] sm:$0xff]  ;;  %vm226_vm12 = vcmask 261120   ;;  %vm314_vm13 = vcmask 64512  }
  0x15   :  { %v53_v18 = vadd.s32 %v52_v13, %v51_v15  ;;  %3036 = vmatprep.subr.mxu0 %v95_v14  ;;  %3051 = vmatprep.subr.mxu1 %v3514_v42  ;;  %v3543_v51 = vld [vmem:[%s4000_s6] sm:$0xff]  ;;  %s3408_s2 = smov 96   ;;  %s3410_s9 = smov 88   ;;  %v3600_v12 = vld [vmem:[%s3997_s3 + $0x8] sm:$0xff]  ;;  %vm398_vm14 = vcmask 130048   ;;  %vm1136_vm15 = vcmask 195584  }
  0x16   :  { %3037 = vmatpush3.msra.mxu0 %v95_v14  ;;  %3052 = vmatpush3.msra.mxu1 %v3514_v42  ;;  %v225_v52 = vrot.slane %v3543_v51, %v3487_v16  ;;  %s3411_s10 = smov 80   ;;  %s3412_s11 = smov 120   ;;  %v3594_v9 = vld [vmem:[%s3997_s3] sm:$0xff] }
  0x17   :  { %v66_v21 = vrot.slane %v53_v18, %v3487_v16  ;;  %3038 = vmatprep.subr.mxu0 %v94_v17  ;;  %3053 = vmatprep.subr.mxu1 %v3518_v43  ;;  %s3413_s14 = smov 48   ;;  %s3414_s15 = smov 72  }
  0x18   :  { %3039 = vmatpush3.msra.mxu0 %v94_v17  ;;  %3054 = vmatpush3.msra.mxu1 %v3518_v43  ;;  %s3415_s16 = smov 104   ;;  %s3416_s17 = smov 64  }
  0x19   :  { %vm67_vm3 = vcmp.eq.s32.totalorder %v3472_v2, %v66_v21  ;;  %vm68_vm4 = vcmp.eq.s32.totalorder %v56_v19, %v66_v21  ;;  %3040 = vmatprep.subr.mxu0 %v93_v20  ;;  %vm69_vm5 = vcmp.eq.s32.totalorder %v57_v22, %v66_v21  ;;  %vm70_vm6 = vcmp.eq.s32.totalorder %v58_v29, %v66_v21  ;;  %s3417_s18 = smov 56   ;;  %s3418_s19 = smov 40  }
  0x1a   :  { %v2825_v25 = vsel %vm67_vm3, 1.0, %v3407_v24  ;;  %3041 = vmatpush3.msra.mxu0 %v93_v20  ;;  %v2826_v27 = vsel %vm68_vm4, 1.0, %v3407_v24  ;;  %v2827_v30 = vsel %vm69_vm5, 1.0, %v3407_v24  ;;  %v2828_v32 = vsel %vm70_vm6, 1.0, %v3407_v24  ;;  %3055 = vmatprep.subr.mxu1 %v3522_v44  ;;  %s3419_s20 = smov 32   ;;  %s3420_s21 = smov 16  }
  0x1b   :  { %101 = vxpose.xlu0.b32.start [1/8] (short) (narrow) %v2825_v25, 16  ;;  %3042 = vmatprep.subr.mxu0 %v92_v23  ;;  %vm71_vm7 = vcmp.eq.s32.totalorder %v59_v31, %v66_v21  ;;  %vm72_vm8 = vcmp.eq.s32.totalorder %v60_v33, %v66_v21  ;;  %vm73_vm9 = vcmp.eq.s32.totalorder %v61_v35, %v66_v21  ;;  %s3421_s22 = smov 24  }
  0x1c   :  { %3043 = vmatpush3.msra.mxu0 %v92_v23  ;;  %v2829_v34 = vsel %vm71_vm7, 1.0, %v3407_v24  ;;  %v2830_v36 = vsel %vm72_vm8, 1.0, %v3407_v24  ;;  %v2831_v38 = vsel %vm73_vm9, 1.0, %v3407_v24  ;;  %vm74_vm10 = vcmp.eq.s32.totalorder %v62_v37, %v66_v21  ;;  %3056 = vmatpush3.msra.mxu1 %v3522_v44 }
  0x1d   :  { %3044 = vmatprep.subr.mxu0 %v91_v26  ;;  %v2832_v39 = vsel %vm74_vm10, 1.0, %v3407_v24 }
  0x1e   :  { %3045 = vmatpush3.msra.mxu0 %v91_v26 }
  0x1f   :  { %102 = vxpose.xlu0.b32.cont [2/8] (short) (narrow) %v2826_v27, 16 }
  0x23   :  { %103 = vxpose.xlu0.b32.cont [3/8] (short) (narrow) %v2827_v30, 16 }
  0x27   :  { %104 = vxpose.xlu0.b32.cont [4/8] (short) (narrow) %v2828_v32, 16 }
  0x2b   :  { %105 = vxpose.xlu0.b32.cont [5/8] (short) (narrow) %v2829_v34, 16 }
  0x2f   :  { %106 = vxpose.xlu0.b32.cont [6/8] (short) (narrow) %v2830_v36, 16 }
  0x33   :  { %107 = vxpose.xlu0.b32.cont [7/8] (short) (narrow) %v2831_v38, 16 }
  0x37   :  { %108 = vxpose.xlu0.b32.end [8/8] (short) (narrow) %v2832_v39, 16 }
  0x97   :  { %v117_v40 = vpop.trf.xlu0 }
  0x98   :  { %3046 = vmatprep.mubr.msk.f32.mxu0 %vm133_vm11, %v117_v40 }
  0x9b   :  { %v118_v41 = vpop.trf.xlu0 }
  0x9c   :  { %3047 = vmatmul.mubr.msk.f32.vlgmr.msra.gmra.mxu0 %vm133_vm11, %v118_v41 }
 0x15c   :  { %v3048_v45 = vpop.f32.mrf.mxu0 }
 0x15d   :  { %v3534_v50 = vadd.f32 %v3048_v45, %v100_v47 }
 0x15e   :  { %v206_v48 = vpop.f32.mrf.mxu0 }
 0x15f   :  { %v3532_v49 = vadd.f32 %v206_v48, %v99_v46 }
 0x161   :  { %3057 = vmatprep.mubr.msk.f32.mxu1 %vm226_vm12, %v3532_v49 }
 0x162   :  { %3058 = vmatmul.mubr.msk.f32.vlgmr.msra.gmra.mxu1 %vm226_vm12, %v3534_v50 }
 0x222   :  { %v3059_v53 = vpop.f32.mrf.mxu1 }
 0x223   :  { %v3547_v54 = vadd.f32 %v3059_v53, %v225_v52 }
 0x224   :  { %v299_v55 = vpop.f32.mrf.mxu1 }
 0x225   :  { %v3549_v56 = vadd.f32 %v299_v55, %v225_v52  ;;  %312 = vrot.lane.b32.xlu1 %v3547_v54, %s3408_s2 }
 0x227   :  { %708 = vrot.lane.b32.xlu0 %v3549_v56, %s3409_s8  ;;  %3064 = vmatprep.mubr.msk.f32.mxu1 %vm314_vm13, %v3549_v56 }
 0x229   :  { %514 = vrot.lane.b32.xlu1 %v3547_v54, %s3410_s9 }
 0x22d   :  { %714 = vrot.lane.b32.xlu1 %v3547_v54, %s3411_s10 }
 0x231   :  { %310 = vrot.lane.b32.xlu1 %v3549_v56, %s3408_s2 }
 0x235   :  { %510 = vrot.lane.b32.xlu1 %v3547_v54, %s3412_s11 }
 0x239   :  { %512 = vrot.lane.b32.xlu1 %v3549_v56, %s3410_s9 }
 0x23d   :  { %508 = vrot.lane.b32.xlu1 %v3549_v56, %s3412_s11 }
 0x241   :  { %712 = vrot.lane.b32.xlu1 %v3549_v56, %s3411_s10 }
 0x245   :  { %710 = vrot.lane.b32.xlu1 %v3547_v54, %s3409_s8 }
 0x297   :  { %v313_v57 = vpop.permute.xlu1 %312 }
 0x298   :  { %3060 = vmatprep.subr.msk.mxu1 %vm314_vm13, %v313_v57 }
 0x299   :  { %3061 = vmatpush3.xpose.msk.msra.mxu1 %vm314_vm13, %v313_v57  ;;  %v709_v0 = vpop.permute.xlu0 %708 }
 0x29b   :  { %v515_v58 = vpop.permute.xlu1 %514 }
 0x29f   :  { %v715_v59 = vpop.permute.xlu1 %714 }
 0x2a3   :  { %v311_v60 = vpop.permute.xlu1 %310 }
 0x2a4   :  { %3062 = vmatprep.subr.msk.mxu1 %vm314_vm13, %v311_v60 }
 0x2a5   :  { %3063 = vmatpush3.xpose.msk.msra.mxu1 %vm314_vm13, %v311_v60 }
 0x2a6   :  { %3074 = vmatprep.subr.msk.mxu1 %vm314_vm13, %v515_v58 }
 0x2a7   :  { %v511_v61 = vpop.permute.xlu1 %510 }
 0x2a8   :  { %3065 = vmatmul.mubr.msk.f32.vlgmr.msra.gmra.mxu1 %vm314_vm13, %v3547_v54 }
 0x2a9   :  { %3075 = vmatpush3.xpose.msk.msra.mxu1 %vm314_vm13, %v515_v58 }
 0x2ab   :  { %v513_v62 = vpop.permute.xlu1 %512 }
 0x2ac   :  { %3076 = vmatprep.subr.msk.mxu1 %vm314_vm13, %v513_v62 }
 0x2ad   :  { %3077 = vmatpush3.xpose.msk.msra.mxu1 %vm314_vm13, %v513_v62 }
 0x2ae   :  { %3088 = vmatprep.subr.msk.mxu1 %vm314_vm13, %v715_v59 }
 0x2af   :  { %v509_v63 = vpop.permute.xlu1 %508 }
 0x2b0   :  { %3078 = vmatprep.mubr.msk.f32.mxu1 %vm314_vm13, %v509_v63 }
 0x2b1   :  { %3079 = vmatmul.mubr.msk.f32.vlgmr.msra.gmra.mxu1 %vm314_vm13, %v511_v61 }
 0x2b2   :  { %3089 = vmatpush3.xpose.msk.msra.mxu1 %vm314_vm13, %v715_v59  ;;  %3092 = vmatprep.mubr.msk.f32.mxu1 %vm314_vm13, %v709_v0 }
 0x2b3   :  { %v713_v1 = vpop.permute.xlu1 %712 }
 0x2b4   :  { %3090 = vmatprep.subr.msk.mxu1 %vm314_vm13, %v713_v1 }
 0x2b6   :  { %3091 = vmatpush3.xpose.msk.msra.mxu1 %vm314_vm13, %v713_v1 }
 0x2b7   :  { %v711_v3 = vpop.permute.xlu1 %710 }
 0x2b9   :  { %3093 = vmatmul.mubr.msk.f32.vlgmr.msra.gmra.mxu1 %vm314_vm13, %v711_v3 }
 0x368   :  { %v3066_v4 = vpop.f32.mrf.mxu1 }
 0x369   :  { %v395_v27 = vadd.f32 %v3066_v4, %v3600_v12 }
 0x36a   :  { %v389_v5 = vpop.f32.mrf.mxu1 }
 0x36b   :  { %v402_v29 = vsel %vm398_vm14, %v395_v27, -inf  ;;  %v390_v30 = vadd.f32 %v389_v5, %v3594_v9 }
 0x36d   :  { %v399_v32 = vsel %vm398_vm14, %v390_v30, -inf }
 0x371   :  { %v3080_v6 = vpop.f32.mrf.mxu1 }
 0x372   :  { %v596_v33 = vadd.f32 %v3080_v6, %v3600_v12 }
 0x373   :  { %v590_v7 = vpop.f32.mrf.mxu1 }
 0x374   :  { %v591_v31 = vadd.f32 %v590_v7, %v3594_v9  ;;  %v602_v35 = vsel %vm398_vm14, %v596_v33, -inf }
 0x376   :  { %v599_v34 = vsel %vm398_vm14, %v591_v31, -inf }
 0x379   :  { %v3094_v8 = vpop.f32.mrf.mxu1 }
 0x37a   :  { %v796_v13 = vadd.f32 %v3094_v8, %v3600_v12 }
 0x37b   :  { %v790_v10 = vpop.f32.mrf.mxu1 }
 0x37c   :  { %v791_v11 = vadd.f32 %v790_v10, %v3594_v9  ;;  %v802_v15 = vsel %vm398_vm14, %v796_v13, -inf }
 0x37e   :  { %v799_v14 = vsel %vm398_vm14, %v791_v11, -inf }
 0x37f   :  { %800 = vmax.xlane.f32.xlu1 %v799_v14 }
 0x383   :  { %803 = vmax.xlane.f32.xlu1 %v802_v15 }
 0x408   :  { %v801_v17 = vpop.xlane.xlu1 %800 }
 0x409   :  { %v805_v18 = vsub.f32 %v791_v11, %v801_v17 }
 0x40b   :  { %v807_v19 = vmul.f32 1.442695, %v805_v18 }
 0x40c   :  { %v804_v20 = vpop.xlane.xlu1 %803 }
 0x40d   :  { %3269 = vpow2.f32 %v807_v19  ;;  %v806_v21 = vsub.f32 %v796_v13, %v804_v20 }
 0x40f   :  { %v809_v22 = vmul.f32 1.442695, %v806_v21 }
 0x411   :  { %3271 = vpow2.f32 %v809_v22 }
 0x41a   :  { %v3270_v23 = vpop.eup %3269 }
 0x41b   :  { %v811_v24 = vsel %vm398_vm14, %v3270_v23, 0.0 }
 0x41c   :  { %812 = vadd.xlane.f32.xlu0 %v811_v24 }
 0x41e   :  { %v3272_v25 = vpop.eup %3271 }
 0x41f   :  { %v814_v26 = vsel %vm398_vm14, %v3272_v25, 0.0 }
 0x420   :  { %815 = vadd.xlane.f32.xlu1 %v814_v26 }
 0x431   :  { %823 = vrot.lane.b32.xlu1 %v3547_v54, %s3413_s14 }
 0x432   :  { %912 = vrot.lane.b32.xlu0 %v3549_v56, %s3414_s15 }
 0x435   :  { %821 = vrot.lane.b32.xlu1 %v3549_v56, %s3413_s14 }
 0x439   :  { %914 = vrot.lane.b32.xlu1 %v3547_v54, %s3414_s15 }
 0x43d   :  { %908 = vrot.lane.b32.xlu1 %v3549_v56, %s3415_s16 }
 0x441   :  { %910 = vrot.lane.b32.xlu1 %v3547_v54, %s3415_s16 }
 0x451   :  { %403 = vmax.xlane.f32.xlu0 %v402_v29 }
 0x465   :  { %400 = vmax.xlane.f32.xlu1 %v399_v32 }
 0x469   :  { %600 = vmax.xlane.f32.xlu1 %v599_v34 }
 0x46d   :  { %603 = vmax.xlane.f32.xlu1 %v602_v35 }
 0x4a5   :  { %v813_v36 = vpop.xlane.xlu0 %812 }
 0x4a6   :  { %3273 = vrcp.f32 %v813_v36 }
 0x4a9   :  { %v816_v37 = vpop.xlane.xlu1 %815  ;;  %v913_v52 = vpop.permute.xlu0 %912 }
 0x4aa   :  { %3275 = vrcp.f32 %v816_v37 }
 0x4ad   :  { %v824_v38 = vpop.permute.xlu1 %823 }
 0x4ae   :  { %3095 = vmatprep.subr.mxu1 %v824_v38 }
 0x4af   :  { %3096 = vmatpush3.msra.mxu1 %v824_v38 }
 0x4b1   :  { %v822_v39 = vpop.permute.xlu1 %821 }
 0x4b2   :  { %3097 = vmatprep.subr.mxu1 %v822_v39 }
 0x4b3   :  { %v3274_v40 = vpop.eup %3273  ;;  %3098 = vmatpush3.msra.mxu1 %v822_v39 }
 0x4b4   :  { %v818_v41 = vmul.f32 %v3274_v40, %v3270_v23 }
 0x4b5   :  { %v915_v45 = vpop.permute.xlu1 %914 }
 0x4b6   :  { %3099 = vmatprep.mubr.msk.f32.mxu1 %vm398_vm14, %v818_v41  ;;  %3102 = vmatprep.subr.msk.mxu1 %vm314_vm13, %v915_v45 }
 0x4b7   :  { %v3276_v46 = vpop.eup %3275 }
 0x4b8   :  { %v820_v47 = vmul.f32 %v3276_v46, %v3272_v25 }
 0x4b9   :  { %v909_v48 = vpop.permute.xlu1 %908 }
 0x4ba   :  { %3100 = vmatmul.mubr.msk.f32.vlgmr.msra.gmra.mxu1 %vm398_vm14, %v820_v47 }
 0x4bb   :  { %3103 = vmatpush3.xpose.msk.msra.mxu1 %vm314_vm13, %v915_v45  ;;  %3106 = vmatprep.mubr.msk.f32.mxu1 %vm314_vm13, %v909_v48 }
 0x4bc   :  { %3104 = vmatprep.subr.msk.mxu1 %vm314_vm13, %v913_v52 }
 0x4bd   :  { %v911_v53 = vpop.permute.xlu1 %910 }
 0x4bf   :  { %3105 = vmatpush3.xpose.msk.msra.mxu1 %vm314_vm13, %v913_v52 }
 0x4c2   :  { %3107 = vmatmul.mubr.msk.f32.vlgmr.msra.gmra.mxu1 %vm314_vm13, %v911_v53 }
 0x4da   :  { %v404_v58 = vpop.xlane.xlu0 %403 }
 0x4db   :  { %v406_v59 = vsub.f32 %v395_v27, %v404_v58 }
 0x4dd   :  { %v409_v62 = vmul.f32 1.442695, %v406_v59 }
 0x4df   :  { %3277 = vpow2.f32 %v409_v62 }
 0x4ec   :  { %v3278_v14 = vpop.eup %3277 }
 0x4ed   :  { %v414_v18 = vsel %vm398_vm14, %v3278_v14, 0.0 }
 0x4ee   :  { %v401_v55 = vpop.xlane.xlu1 %400 }
 0x4ef   :  { %v405_v61 = vsub.f32 %v390_v30, %v401_v55 }
 0x4f1   :  { %v407_v0 = vmul.f32 1.442695, %v405_v61 }
 0x4f2   :  { %v601_v57 = vpop.xlane.xlu1 %600 }
 0x4f3   :  { %v605_v1 = vsub.f32 %v591_v31, %v601_v57  ;;  %3279 = vpow2.f32 %v407_v0 }
 0x4f5   :  { %v607_v4 = vmul.f32 1.442695, %v605_v1 }
 0x4f6   :  { %v604_v60 = vpop.xlane.xlu1 %603 }
 0x4f7   :  { %v606_v63 = vsub.f32 %v596_v33, %v604_v60 }
 0x4f9   :  { %v609_v3 = vmul.f32 1.442695, %v606_v63 }
 0x4fb   :  { %3281 = vpow2.f32 %v609_v3 }
 0x4fc   :  { %3283 = vpow2.f32 %v607_v4 }
 0x500   :  { %v3280_v17 = vpop.eup %3279 }
 0x501   :  { %v411_v20 = vsel %vm398_vm14, %v3280_v17, 0.0 }
 0x508   :  { %v3282_v19 = vpop.eup %3281 }
 0x509   :  { %v3284_v21 = vpop.eup %3283  ;;  %v614_v22 = vsel %vm398_vm14, %v3282_v19, 0.0 }
 0x50a   :  { %v611_v23 = vsel %vm398_vm14, %v3284_v21, 0.0 }
 0x57a   :  { %v3635_v5 = vpop.f32.mrf.mxu1 }
 0x57c   :  { %v3637_v6 = vpop.f32.mrf.mxu1 }
 0x582   :  { %v3108_v7 = vpop.f32.mrf.mxu1 }
 0x583   :  { %v996_v8 = vadd.f32 %v3108_v7, %v3600_v12 }
 0x584   :  { %v990_v10 = vpop.f32.mrf.mxu1 }
 0x585   :  { %v991_v11 = vadd.f32 %v990_v10, %v3594_v9  ;;  %v1002_v13 = vsel %vm398_vm14, %v996_v8, -inf }
 0x586   :  { %1003 = vmax.xlane.f32.xlu1 %v1002_v13 }
 0x587   :  { %v999_v15 = vsel %vm398_vm14, %v991_v11, -inf }
 0x588   :  { %1000 = vmax.xlane.f32.xlu0 %v999_v15 }
 0x58a   :  { %415 = vadd.xlane.f32.xlu1 %v414_v18 }
 0x58c   :  { %412 = vadd.xlane.f32.xlu0 %v411_v20 }
 0x58e   :  { %615 = vadd.xlane.f32.xlu1 %v614_v22 }
 0x590   :  { %612 = vadd.xlane.f32.xlu0 %v611_v23  ;;  %v1141_v23 = vsub.s32 2, %v3472_v2 }
 0x59f   :  { %421 = vrot.lane.b32.xlu1 %v3549_v56, %s3416_s17 }
 0x5a3   :  { %623 = vrot.lane.b32.xlu1 %v3547_v54, %s3417_s18 }
 0x5a6   :  { %423 = vrot.lane.b32.xlu0 %v3547_v54, %s3416_s17 }
 0x5a7   :  { %621 = vrot.lane.b32.xlu1 %v3549_v56, %s3417_s18 }
 0x60f   :  { %v1004_v24 = vpop.xlane.xlu1 %1003 }
 0x610   :  { %v1006_v25 = vsub.f32 %v996_v8, %v1004_v24  ;;  %v1142_v24 = vrot.slane %v3543_v51, %v1141_v23 }
 0x611   :  { %v1001_v26 = vpop.xlane.xlu0 %1000 }
 0x612   :  { %v1009_v27 = vmul.f32 1.442695, %v1006_v25  ;;  %v1005_v29 = vsub.f32 %v991_v11, %v1001_v26 }
 0x613   :  { %v416_v30 = vpop.xlane.xlu1 %415 }
 0x614   :  { %3285 = vpow2.f32 %v1009_v27  ;;  %v1007_v31 = vmul.f32 1.442695, %v1005_v29 }
 0x615   :  { %3287 = vrcp.f32 %v416_v30  ;;  %v413_v32 = vpop.xlane.xlu0 %412 }
 0x616   :  { %3289 = vpow2.f32 %v1007_v31 }
 0x617   :  { %3291 = vrcp.f32 %v413_v32  ;;  %v616_v33 = vpop.xlane.xlu1 %615 }
 0x618   :  { %3293 = vrcp.f32 %v616_v33 }
 0x619   :  { %v613_v34 = vpop.xlane.xlu0 %612 }
 0x61a   :  { %3295 = vrcp.f32 %v613_v34 }
 0x61b   :  { %v422_v35 = vpop.permute.xlu1 %421 }
 0x61d   :  { %v424_v36 = vpop.permute.xlu0 %423 }
 0x61e   :  { %3067 = vmatprep.subr.mxu0 %v424_v36 }
 0x61f   :  { %3068 = vmatpush3.msra.mxu0 %v424_v36  ;;  %v624_v38 = vpop.permute.xlu1 %623 }
 0x620   :  { %3069 = vmatprep.subr.mxu0 %v422_v35 }
 0x621   :  { %v3286_v37 = vpop.eup %3285  ;;  %3070 = vmatpush3.msra.mxu0 %v422_v35 }
 0x622   :  { %v3288_v39 = vpop.eup %3287  ;;  %3081 = vmatprep.subr.mxu0 %v624_v38  ;;  %v1014_v40 = vsel %vm398_vm14, %v3286_v37, 0.0 }
 0x623   :  { %v3290_v41 = vpop.eup %3289  ;;  %1015 = vadd.xlane.f32.xlu1 %v1014_v40  ;;  %v420_v52 = vmul.f32 %v3288_v39, %v3278_v14  ;;  %v622_v57 = vpop.permute.xlu1 %621 }
 0x624   :  { %v3292_v45 = vpop.eup %3291  ;;  %v1011_v46 = vsel %vm398_vm14, %v3290_v41, 0.0 }
 0x625   :  { %1012 = vadd.xlane.f32.xlu0 %v1011_v46  ;;  %v418_v47 = vmul.f32 %v3292_v45, %v3280_v17  ;;  %v3294_v48 = vpop.eup %3293  ;;  %v1283_v46 = vld [vmem:[%s3999_s5 + $0x10] sm:$0xff] }
 0x626   :  { %v620_v58 = vmul.f32 %v3294_v48, %v3282_v19  ;;  %v1281_v48 = vld [vmem:[%s3999_s5] sm:$0xff] }
 0x627   :  { %v3296_v53 = vpop.eup %3295  ;;  %3071 = vmatprep.mubr.msk.f32.mxu0 %vm398_vm14, %v418_v47  ;;  %v1282_v47 = vld [vmem:[%s3999_s5 + $0x8] sm:$0xff] }
 0x628   :  { %3072 = vmatmul.mubr.msk.f32.vlgmr.msra.gmra.mxu0 %vm398_vm14, %v420_v52  ;;  %v618_v55 = vmul.f32 %v3296_v53, %v3284_v21 }
 0x629   :  { %3082 = vmatpush3.msra.mxu0 %v624_v38 }
 0x62a   :  { %3083 = vmatprep.subr.mxu0 %v622_v57  ;;  %3085 = vmatprep.mubr.msk.f32.mxu0 %vm398_vm14, %v618_v55 }
 0x62b   :  { %3084 = vmatpush3.msra.mxu0 %v622_v57 }
 0x62c   :  { %3086 = vmatmul.mubr.msk.f32.vlgmr.msra.gmra.mxu0 %vm398_vm14, %v620_v58 }
 0x634   :  { %1021 = vrot.lane.b32.xlu1 %v3549_v56, %s3418_s19 }
 0x638   :  { %1151 = vrot.lane.b32.xlu1 %v3514_v42, %s3419_s20 }
 0x63b   :  { %1023 = vrot.lane.b32.xlu0 %v3547_v54, %s3418_s19 }
 0x63c   :  { %1149 = vrot.lane.b32.xlu1 %v3518_v43, %s3419_s20 }
 0x63f   :  { %1153 = vrot.lane.b32.xlu0 %v3505_v28, %s3419_s20 }
 0x640   :  { %1118 = vrot.lane.b32.xlu1 %v3637_v6, %s3420_s21 }
 0x6ac   :  { %v1016_v59 = vpop.xlane.xlu1 %1015 }
 0x6ad   :  { %3297 = vrcp.f32 %v1016_v59 }
 0x6ae   :  { %v1013_v56 = vpop.xlane.xlu0 %1012 }
 0x6af   :  { %3299 = vrcp.f32 %v1013_v56  ;;  %v1271_v56 = vsub.s32 3, %v3472_v2 }
 0x6b0   :  { %v1022_v42 = vpop.permute.xlu1 %1021 }
 0x6b2   :  { %v1024_v60 = vpop.permute.xlu0 %1023 }
 0x6b3   :  { %3109 = vmatprep.subr.mxu0 %v1024_v60 }
 0x6b4   :  { %3110 = vmatpush3.msra.mxu0 %v1024_v60  ;;  %v1152_v62 = vpop.permute.xlu1 %1151  ;;  %v1277_v60 = vsub.s32 4, %v3472_v2 }
 0x6b5   :  { %3111 = vmatprep.subr.mxu0 %v1022_v42 }
 0x6b6   :  { %3112 = vmatpush3.msra.mxu0 %v1022_v42  ;;  %v1154_v54 = vpop.permute.xlu0 %1153  ;;  %v1272_v42 = vrot.slane %v3543_v51, %v1271_v56 }
 0x6b7   :  { %3116 = vmatprep.subr.mxu0 %v1154_v54 }
 0x6b8   :  { %v1150_v0 = vpop.permute.xlu1 %1149 }
 0x6ba   :  { %v3298_v43 = vpop.eup %3297 }
 0x6bb   :  { %v1020_v63 = vmul.f32 %v3298_v43, %v3286_v37 }
 0x6bc   :  { %v3300_v61 = vpop.eup %3299 }
 0x6bd   :  { %v1018_v28 = vmul.f32 %v3300_v61, %v3290_v41  ;;  %v1278_v61 = vrot.slane %v3543_v51, %v1277_v60 }
 0x6bf   :  { %3113 = vmatprep.mubr.msk.f32.mxu0 %vm398_vm14, %v1018_v28 }
 0x6c0   :  { %3114 = vmatmul.mubr.msk.f32.vlgmr.msra.gmra.mxu0 %vm398_vm14, %v1020_v63 }
 0x6c1   :  { %3117 = vmatpush3.msra.mxu0 %v1154_v54 }
 0x6c2   :  { %3118 = vmatprep.subr.mxu0 %v1152_v62 }
 0x6c3   :  { %3119 = vmatpush3.msra.mxu0 %v1152_v62 }
 0x6c4   :  { %3120 = vmatprep.subr.mxu0 %v1150_v0 }
 0x6c5   :  { %3121 = vmatpush3.msra.mxu0 %v1150_v0 }
 0x6e8   :  { %v3073_v1 = vpop.f32.mrf.mxu0 }
 0x6ea   :  { %v499_v3 = vpop.f32.mrf.mxu0 }
 0x6ec   :  { %v3087_v4 = vpop.f32.mrf.mxu0 }
 0x6ee   :  { %v699_v6 = vpop.f32.mrf.mxu0 }
 0x6ef   :  { %1110 = vrot.lane.b32.xlu0 %v699_v6, %s3405_s28  ;;  %v2865_v6 = vld [vmem:[%s3999_s5 + $0x30] sm:$0xff] }
 0x6f3   :  { %1112 = vrot.lane.b32.xlu0 %v3087_v4, %s3405_s28  ;;  %v2866_v4 = vld [vmem:[%s3999_s5 + $0x38] sm:$0xff] }
 0x6f7   :  { %1120 = vrot.lane.b32.xlu0 %v3635_v5, %s3420_s21  ;;  %v1119_v5 = vpop.permute.xlu1 %1118 }
 0x6fb   :  { %1147 = vrot.lane.b32.xlu0 %v3522_v44, %s3419_s20 }
 0x761   :  { %v1111_v7 = vpop.permute.xlu0 %1110 }
 0x762   :  { %v1132_v44 = vsel %vm314_vm13, %v499_v3, %v1111_v7  ;;  %v2864_v7 = vld [vmem:[%s3999_s5 + $0x28] sm:$0xff] }
 0x763   :  { %v1134_v18 = vsel %vm398_vm14, %v1132_v44, %v1119_v5 }
 0x765   :  { %v1113_v8 = vpop.permute.xlu0 %1112 }
 0x766   :  { %v1133_v10 = vsel %vm314_vm13, %v3073_v1, %v1113_v8  ;;  %v2863_v8 = vld [vmem:[%s3999_s5 + $0x20] sm:$0xff] }
 0x769   :  { %v1121_v11 = vpop.permute.xlu0 %1120 }
 0x76a   :  { %v1135_v13 = vsel %vm398_vm14, %v1133_v10, %v1121_v11  ;;  %v1292_v10 = vsub.s32 1, %v3472_v2 }
 0x76c   :  { %v1293_v11 = vrot.slane %v3543_v51, %v1292_v10 }
 0x76d   :  { %v1148_v14 = vpop.permute.xlu0 %1147 }
 0x76e   :  { %3122 = vmatprep.subr.mxu0 %v1148_v14 }
 0x76f   :  { %3123 = vmatpush3.msra.mxu0 %v1148_v14 }
 0x770   :  { %3138 = vmatprep.subr.mxu0 %v2866_v4 }
 0x780   :  { %v3115_v15 = vpop.f32.mrf.mxu0 }
 0x782   :  { %v1099_v17 = vpop.f32.mrf.mxu0 }
 0x783   :  { %1126 = vrot.lane.b32.xlu1 %v1099_v17, %s3421_s22 }
 0x787   :  { %1128 = vrot.lane.b32.xlu1 %v3115_v15, %s3421_s22 }
 0x7f5   :  { %v1127_v19 = vpop.permute.xlu1 %1126 }
 0x7f6   :  { %v1137_v20 = vsel %vm1136_vm15, %v1134_v18, %v1127_v19 }
 0x7f7   :  { %3124 = vmatprep.mubr.msk.f32.mxu0 %vm226_vm12, %v1137_v20 }
 0x7f9   :  { %v1129_v21 = vpop.permute.xlu1 %1128 }
 0x7fa   :  { %v1138_v22 = vsel %vm1136_vm15, %v1135_v13, %v1129_v21 }
 0x7fb   :  { %3125 = vmatmul.mubr.msk.f32.vlgmr.msra.gmra.mxu0 %vm226_vm12, %v1138_v22 }
 0x7fc   :  { %3139 = vmatpush3.xpose.msra.mxu0 %v2866_v4 }
 0x7fd   :  { %3140 = vmatprep.subr.mxu0 %v2865_v6 }
 0x800   :  { %3141 = vmatpush3.xpose.msra.mxu0 %v2865_v6 }
 0x801   :  { %3142 = vmatprep.subr.mxu0 %v2864_v7 }
 0x804   :  { %3143 = vmatpush3.xpose.msra.mxu0 %v2864_v7  ;;  %v1502_v7 = vsub.s32 5, %v3472_v2 }
 0x805   :  { %3144 = vmatprep.subr.mxu0 %v2863_v8 }
 0x808   :  { %3145 = vmatpush3.xpose.msra.mxu0 %v2863_v8 }
 0x8bb   :  { %v3126_v25 = vpop.f32.mrf.mxu0 }
 0x8bc   :  { %v1237_v26 = vadd.f32 %v3126_v25, %v1142_v24 }
 0x8bd   :  { %v1231_v27 = vpop.f32.mrf.mxu0 }
 0x8be   :  { %v1232_v29 = vadd.f32 %v1231_v27, %v1142_v24  ;;  %v1241_v30 = vadd.f32 %v1237_v26, %v3534_v50 }
 0x8c0   :  { %v1245_v31 = vsel %vm226_vm12, %v1241_v30, 0.0  ;;  %v1240_v32 = vadd.f32 %v1232_v29, %v3532_v49  ;;  %v1284_v49 = vld [vmem:[%s3999_s5 + $0x18] sm:$0xff] }
 0x8c1   :  { %1246 = vadd.xlane.f32.xlu1 %v1245_v31  ;;  %3127 = vmatprep.subr.mxu1 %v1284_v49 }
 0x8c2   :  { %v1242_v33 = vsel %vm226_vm12, %v1240_v32, 0.0  ;;  %3128 = vmatpush3.msra.mxu1 %v1284_v49 }
 0x8c3   :  { %1243 = vadd.xlane.f32.xlu0 %v1242_v33  ;;  %3129 = vmatprep.subr.mxu1 %v1283_v46 }
 0x8c4   :  { %3130 = vmatpush3.msra.mxu1 %v1283_v46 }
 0x8c5   :  { %3131 = vmatprep.subr.mxu1 %v1282_v47 }
 0x8c6   :  { %3132 = vmatpush3.msra.mxu1 %v1282_v47 }
 0x8c7   :  { %3133 = vmatprep.subr.mxu1 %v1281_v48 }
 0x8c8   :  { %3134 = vmatpush3.msra.mxu1 %v1281_v48 }
 0x94a   :  { %v1247_v34 = vpop.xlane.xlu1 %1246 }
 0x94b   :  { %v1250_v35 = vmul.f32 0.03125, %v1247_v34 }
 0x94c   :  { %v1244_v36 = vpop.xlane.xlu0 %1243 }
 0x94d   :  { %v1249_v37 = vmul.f32 0.03125, %v1244_v36  ;;  %v1252_v38 = vsub.f32 %v1241_v30, %v1250_v35  ;;  %v1395_v36 = vsub.s32 7, %v3472_v2 }
 0x94f   :  { %v1251_v39 = vsub.f32 %v1240_v32, %v1249_v37  ;;  %v1254_v45 = vmul.f32 %v1252_v38, %v1252_v38  ;;  %v1396_v37 = vrot.slane %v3543_v51, %v1395_v36 }
 0x951   :  { %v1253_v40 = vmul.f32 %v1251_v39, %v1251_v39  ;;  %v1258_v50 = vsel %vm226_vm12, %v1254_v45, 0.0 }
 0x953   :  { %v1255_v41 = vsel %vm226_vm12, %v1253_v40, 0.0 }
 0x954   :  { %1256 = vadd.xlane.f32.xlu0 %v1255_v41 }
 0x958   :  { %1259 = vadd.xlane.f32.xlu0 %v1258_v50 }
 0x9dd   :  { %v1257_v52 = vpop.xlane.xlu0 %1256 }
 0x9de   :  { %v1261_v53 = vmul.f32 0.03125, %v1257_v52 }
 0x9e0   :  { %v1263_v55 = vadd.f32 1e-05, %v1261_v53 }
 0x9e1   :  { %v1260_v57 = vpop.xlane.xlu0 %1259 }
 0x9e2   :  { %3301 = vrsqrt.f32 %v1263_v55  ;;  %v1262_v58 = vmul.f32 0.03125, %v1260_v57 }
 0x9e4   :  { %v1264_v59 = vadd.f32 1e-05, %v1262_v58 }
 0x9e6   :  { %3303 = vrsqrt.f32 %v1264_v59 }
 0x9ef   :  { %v3302_v54 = vpop.eup %3301 }
 0x9f0   :  { %v1267_v43 = vmul.f32 %v3302_v54, %v1251_v39 }
 0x9f2   :  { %v1273_v62 = vmul.f32 %v1272_v42, %v1267_v43  ;;  %v3747_v43 = vld [vmem:[#allocation2 + $0x38] sm:$0xff] }
 0x9f3   :  { %v3304_v28 = vpop.eup %3303  ;;  %3149 = vmatprep.subr.mxu1 %v3747_v43 }
 0x9f4   :  { %v1268_v63 = vmul.f32 %v3304_v28, %v1252_v38  ;;  %v1279_v0 = vadd.f32 %v1278_v61, %v1273_v62  ;;  %v3753_v62 = vld [vmem:[#allocation2 + $0x28] sm:$0xff]  ;;  %v3757_v28 = vld [vmem:[#allocation2 + $0x20] sm:$0xff] }
 0x9f6   :  { %v1274_v1 = vmul.f32 %v1272_v42, %v1268_v63  ;;  %3135 = vmatprep.mubr.msk.f32.mxu1 %vm226_vm12, %v1279_v0 }
 0x9f8   :  { %v1280_v3 = vadd.f32 %v1278_v61, %v1274_v1  ;;  %v3749_v61 = vld [vmem:[#allocation2 + $0x30] sm:$0xff] }
 0x9fa   :  { %3136 = vmatmul.mubr.msk.f32.vlgmr.msra.gmra.mxu1 %vm226_vm12, %v1280_v3 }
 0x9fb   :  { %3150 = vmatpush3.msra.mxu1 %v3747_v43 }
 0x9fc   :  { %3151 = vmatprep.subr.mxu1 %v3749_v61 }
 0x9fd   :  { %3152 = vmatpush3.msra.mxu1 %v3749_v61 }
 0x9fe   :  { %3153 = vmatprep.subr.mxu1 %v3753_v62 }
 0x9ff   :  { %3154 = vmatpush3.msra.mxu1 %v3753_v62 }
 0xa00   :  { %3155 = vmatprep.subr.mxu1 %v3757_v28 }
 0xa01   :  { %3156 = vmatpush3.msra.mxu1 %v3757_v28 }
 0xaba   :  { %v3137_v13 = vpop.f32.mrf.mxu1 }
 0xabb   :  { %v1372_v14 = vadd.f32 %v3137_v13, %v1293_v11  ;;  %v1508_v13 = vsub.s32 6, %v3472_v2 }
 0xabc   :  { %v1366_v15 = vpop.f32.mrf.mxu1 }
 0xabd   :  { %v1378_v17 = vmul.f32 0.044715, %v1372_v14  ;;  %v1367_v5 = vadd.f32 %v1366_v15, %v1293_v11  ;;  %v1376_v33 = vmul.f32 0.5, %v1372_v14  ;;  %v1503_v11 = vrot.slane %v3543_v51, %v1502_v7 }
 0xabf   :  { %v1380_v44 = vmul.f32 %v1378_v17, %v1372_v14  ;;  %v1377_v18 = vmul.f32 0.044715, %v1367_v5  ;;  %v1375_v31 = vmul.f32 0.5, %v1367_v5 }
 0xac1   :  { %v1382_v19 = vmul.f32 %v1380_v44, %v1372_v14  ;;  %v1379_v20 = vmul.f32 %v1377_v18, %v1367_v5  ;;  %v1509_v44 = vrot.slane %v3543_v51, %v1508_v13 }
 0xac3   :  { %v1384_v21 = vadd.f32 %v1382_v19, %v1372_v14  ;;  %v1381_v22 = vmul.f32 %v1379_v20, %v1367_v5 }
 0xac5   :  { %v1383_v24 = vadd.f32 %v1381_v22, %v1367_v5  ;;  %v1386_v25 = vmul.f32 0.7978845, %v1384_v21  ;;  %v3782_v21 = vld [vmem:[%s4000_s6 + $0x8] sm:$0xff] }
 0xac6   :  { %v1522_v22 = vrot.slane %v3782_v21, %v3487_v16 }
 0xac7   :  { %v1385_v26 = vmul.f32 0.7978845, %v1383_v24  ;;  %3305 = vtanh.f32 %v1386_v25 }
 0xac9   :  { %3307 = vtanh.f32 %v1385_v26 }
 0xad4   :  { %v3306_v27 = vpop.eup %3305 }
 0xad5   :  { %v1390_v30 = vadd.f32 1.0, %v3306_v27 }
 0xad6   :  { %v3308_v29 = vpop.eup %3307 }
 0xad7   :  { %v1389_v32 = vadd.f32 1.0, %v3308_v29  ;;  %v1392_v35 = vmul.f32 %v1390_v30, %v1376_v33 }
 0xad9   :  { %v1391_v34 = vmul.f32 %v1389_v32, %v1375_v31 }
 0xadb   :  { %3146 = vmatprep.mubr.f32.mxu0 %v1391_v34 }
 0xadc   :  { %3147 = vmatmul.mubr.f32.vlgmr.msra.gmra.mxu0 %v1392_v35 }
 0xb9c   :  { %v3148_v38 = vpop.f32.mrf.mxu0 }
 0xb9d   :  { %v1469_v39 = vadd.f32 %v3148_v38, %v1396_v37 }
 0xb9e   :  { %v1463_v40 = vpop.f32.mrf.mxu0 }
 0xb9f   :  { %v1464_v41 = vadd.f32 %v1463_v40, %v1396_v37  ;;  %v1473_v45 = vadd.f32 %v1469_v39, %v1280_v3 }
 0xba1   :  { %v1477_v50 = vsel %vm226_vm12, %v1473_v45, 0.0  ;;  %v1472_v49 = vadd.f32 %v1464_v41, %v1279_v0 }
 0xba2   :  { %1478 = vadd.xlane.f32.xlu1 %v1477_v50 }
 0xba3   :  { %v1474_v46 = vsel %vm226_vm12, %v1472_v49, 0.0 }
 0xba4   :  { %1475 = vadd.xlane.f32.xlu0 %v1474_v46 }
 0xc2b   :  { %v1479_v47 = vpop.xlane.xlu1 %1478 }
 0xc2c   :  { %v1481_v48 = vmul.f32 0.03125, %v1479_v47 }
 0xc2d   :  { %v1476_v52 = vpop.xlane.xlu0 %1475 }
 0xc2e   :  { %v1483_v53 = vsub.f32 %v1473_v45, %v1481_v48  ;;  %v1480_v55 = vmul.f32 0.03125, %v1476_v52 }
 0xc30   :  { %v1482_v57 = vsub.f32 %v1472_v49, %v1480_v55  ;;  %v1485_v58 = vmul.f32 %v1483_v53, %v1483_v53 }
 0xc32   :  { %v1489_v59 = vsel %vm226_vm12, %v1485_v58, 0.0  ;;  %v1484_v42 = vmul.f32 %v1482_v57, %v1482_v57 }
 0xc33   :  { %1490 = vadd.xlane.f32.xlu1 %v1489_v59 }
 0xc34   :  { %v1486_v54 = vsel %vm226_vm12, %v1484_v42, 0.0 }
 0xc35   :  { %1487 = vadd.xlane.f32.xlu0 %v1486_v54 }
 0xcbc   :  { %v1491_v63 = vpop.xlane.xlu1 %1490 }
 0xcbd   :  { %v1493_v0 = vmul.f32 0.03125, %v1491_v63 }
 0xcbe   :  { %v1488_v1 = vpop.xlane.xlu0 %1487 }
 0xcbf   :  { %v1495_v3 = vadd.f32 1e-05, %v1493_v0  ;;  %v1492_v4 = vmul.f32 0.03125, %v1488_v1 }
 0xcc1   :  { %3309 = vrsqrt.f32 %v1495_v3  ;;  %v1494_v6 = vadd.f32 1e-05, %v1492_v4 }
 0xcc3   :  { %3311 = vrsqrt.f32 %v1494_v6 }
 0xcce   :  { %v3310_v8 = vpop.eup %3309 }
 0xccf   :  { %v1499_v14 = vmul.f32 %v3310_v8, %v1483_v53 }
 0xcd0   :  { %v3312_v15 = vpop.eup %3311 }
 0xcd1   :  { %v1498_v17 = vmul.f32 %v3312_v15, %v1482_v57  ;;  %v1505_v5 = vmul.f32 %v1503_v11, %v1499_v14 }
 0xcd3   :  { %v1504_v18 = vmul.f32 %v1503_v11, %v1498_v17  ;;  %v3773_v20 = vadd.f32 %v1509_v44, %v1505_v5 }
 0xcd5   :  { %v3771_v19 = vadd.f32 %v1509_v44, %v1504_v18 }
 0xcd7   :  { %3157 = vmatprep.mubr.msk.f32.mxu1 %vm226_vm12, %v3771_v19 }
 0xcd8   :  { %3158 = vmatmul.mubr.msk.f32.vlgmr.msra.gmra.mxu1 %vm226_vm12, %v3773_v20 }
 0xd98   :  { %v3159_v51 = vpop.f32.mrf.mxu1 }
 0xd99   :  { %v3786_v24 = vadd.f32 %v3159_v51, %v1522_v22 }
 0xd9a   :  { %v1595_v25 = vpop.f32.mrf.mxu1 }
 0xd9b   :  { %v3788_v26 = vadd.f32 %v1595_v25, %v1522_v22  ;;  %1608 = vrot.lane.b32.xlu0 %v3786_v24, %s3408_s2 }
 0xd9d   :  { %1606 = vrot.lane.b32.xlu1 %v3788_v26, %s3408_s2  ;;  %3164 = vmatprep.mubr.msk.f32.mxu1 %vm314_vm13, %v3788_v26 }
 0xd9f   :  { %1802 = vrot.lane.b32.xlu0 %v3788_v26, %s3412_s11 }
 0xda1   :  { %1808 = vrot.lane.b32.xlu1 %v3786_v24, %s3410_s9 }
 0xda5   :  { %1806 = vrot.lane.b32.xlu1 %v3788_v26, %s3410_s9 }
 0xda9   :  { %1804 = vrot.lane.b32.xlu1 %v3786_v24, %s3412_s11 }
 0xe0d   :  { %v1609_v16 = vpop.permute.xlu0 %1608 }
 0xe0e   :  { %3160 = vmatprep.subr.msk.mxu1 %vm314_vm13, %v1609_v16 }
 0xe0f   :  { %3161 = vmatpush3.xpose.msk.msra.mxu1 %vm314_vm13, %v1609_v16  ;;  %v1607_v27 = vpop.permute.xlu1 %1606 }
 0xe10   :  { %3162 = vmatprep.subr.msk.mxu1 %vm314_vm13, %v1607_v27 }
 0xe11   :  { %v1803_v30 = vpop.permute.xlu0 %1802 }
 0xe13   :  { %3163 = vmatpush3.xpose.msk.msra.mxu1 %vm314_vm13, %v1607_v27  ;;  %v1809_v29 = vpop.permute.xlu1 %1808 }
 0xe14   :  { %3174 = vmatprep.subr.msk.mxu1 %vm314_vm13, %v1809_v29 }
 0xe16   :  { %3165 = vmatmul.mubr.msk.f32.vlgmr.msra.gmra.mxu1 %vm314_vm13, %v3786_v24 }
 0xe17   :  { %v1807_v31 = vpop.permute.xlu1 %1806  ;;  %3175 = vmatpush3.xpose.msk.msra.mxu1 %vm314_vm13, %v1809_v29  ;;  %3178 = vmatprep.mubr.msk.f32.mxu1 %vm314_vm13, %v1803_v30 }
 0xe18   :  { %3176 = vmatprep.subr.msk.mxu1 %vm314_vm13, %v1807_v31 }
 0xe1b   :  { %3177 = vmatpush3.xpose.msk.msra.mxu1 %vm314_vm13, %v1807_v31  ;;  %v1805_v32 = vpop.permute.xlu1 %1804 }
 0xe1e   :  { %3179 = vmatmul.mubr.msk.f32.vlgmr.msra.gmra.mxu1 %vm314_vm13, %v1805_v32 }
 0xed6   :  { %v3166_v33 = vpop.f32.mrf.mxu1 }
 0xed7   :  { %v1690_v34 = vadd.f32 %v3166_v33, %v3600_v12 }
 0xed8   :  { %v1684_v35 = vpop.f32.mrf.mxu1 }
 0xed9   :  { %v1685_v37 = vadd.f32 %v1684_v35, %v3594_v9  ;;  %v1696_v38 = vsel %vm398_vm14, %v1690_v34, -inf }
 0xeda   :  { %1697 = vmax.xlane.f32.xlu1 %v1696_v38 }
 0xedb   :  { %v1693_v39 = vsel %vm398_vm14, %v1685_v37, -inf }
 0xedc   :  { %1694 = vmax.xlane.f32.xlu0 %v1693_v39 }
 0xede   :  { %v3180_v40 = vpop.f32.mrf.mxu1 }
 0xedf   :  { %v1890_v50 = vadd.f32 %v3180_v40, %v3600_v12 }
 0xee0   :  { %v1884_v41 = vpop.f32.mrf.mxu1 }
 0xee1   :  { %v1885_v45 = vadd.f32 %v1884_v41, %v3594_v9  ;;  %v1896_v46 = vsel %vm398_vm14, %v1890_v50, -inf }
 0xee3   :  { %v1893_v49 = vsel %vm398_vm14, %v1885_v45, -inf }
 0xee4   :  { %1894 = vmax.xlane.f32.xlu0 %v1893_v49 }
 0xee8   :  { %1897 = vmax.xlane.f32.xlu0 %v1896_v46 }
 0xeeb   :  { %1715 = vrot.lane.b32.xlu1 %v3788_v26, %s3416_s17 }
 0xeef   :  { %1917 = vrot.lane.b32.xlu1 %v3786_v24, %s3417_s18 }
 0xef3   :  { %1915 = vrot.lane.b32.xlu1 %v3788_v26, %s3417_s18 }
 0xefe   :  { %1717 = vrot.lane.b32.xlu0 %v3786_v24, %s3416_s17 }
 0xf63   :  { %v1698_v9 = vpop.xlane.xlu1 %1697 }
 0xf64   :  { %v1700_v47 = vsub.f32 %v1690_v34, %v1698_v9 }
 0xf65   :  { %v1695_v48 = vpop.xlane.xlu0 %1694 }
 0xf66   :  { %v1703_v52 = vmul.f32 1.442695, %v1700_v47  ;;  %v1699_v53 = vsub.f32 %v1685_v37, %v1695_v48  ;;  %v3357_v47 = vld [vmem:[%s3997_s3] sm:$0xff] }
 0xf67   :  { %v1716_v63 = vpop.permute.xlu1 %1715 }
 0xf68   :  { %3313 = vpow2.f32 %v1703_v52  ;;  %v1701_v55 = vmul.f32 1.442695, %v1699_v53 }
 0xf6a   :  { %3315 = vpow2.f32 %v1701_v55 }
 0xf6b   :  { %v1918_v11 = vpop.permute.xlu1 %1917 }
 0xf6d   :  { %v1895_v57 = vpop.xlane.xlu0 %1894 }
 0xf6e   :  { %v1899_v58 = vsub.f32 %v1885_v45, %v1895_v57 }
 0xf6f   :  { %v1916_v44 = vpop.permute.xlu1 %1915 }
 0xf70   :  { %v1901_v59 = vmul.f32 1.442695, %v1899_v58 }
 0xf71   :  { %v1898_v42 = vpop.xlane.xlu0 %1897 }
 0xf72   :  { %3317 = vpow2.f32 %v1901_v59  ;;  %v1900_v54 = vsub.f32 %v1890_v50, %v1898_v42 }
 0xf74   :  { %v1903_v0 = vmul.f32 1.442695, %v1900_v54 }
 0xf75   :  { %v3314_v1 = vpop.eup %3313  ;;  %v1718_v3 = vpop.permute.xlu0 %1717 }
 0xf76   :  { %3319 = vpow2.f32 %v1903_v0  ;;  %3167 = vmatprep.subr.mxu0 %v1718_v3  ;;  %v1708_v4 = vsel %vm398_vm14, %v3314_v1, 0.0 }
 0xf77   :  { %v3316_v6 = vpop.eup %3315  ;;  %1709 = vadd.xlane.f32.xlu1 %v1708_v4  ;;  %3168 = vmatpush3.msra.mxu0 %v1718_v3 }
 0xf78   :  { %3169 = vmatprep.subr.mxu0 %v1716_v63  ;;  %v1705_v8 = vsel %vm398_vm14, %v3316_v6, 0.0 }
 0xf79   :  { %1706 = vadd.xlane.f32.xlu0 %v1705_v8  ;;  %3170 = vmatpush3.msra.mxu0 %v1716_v63 }
 0xf7a   :  { %3181 = vmatprep.subr.mxu0 %v1918_v11 }
 0xf7f   :  { %v3318_v14 = vpop.eup %3317 }
 0xf80   :  { %v1905_v15 = vsel %vm398_vm14, %v3318_v14, 0.0 }
 0xf81   :  { %1906 = vadd.xlane.f32.xlu0 %v1905_v15 }
 0xf83   :  { %v3320_v17 = vpop.eup %3319 }
 0xf84   :  { %v1908_v5 = vsel %vm398_vm14, %v3320_v17, 0.0 }
 0xf85   :  { %1909 = vadd.xlane.f32.xlu1 %v1908_v5 }
 0xf96   :  { %2006 = vrot.lane.b32.xlu1 %v3788_v26, %s3411_s10 }
 0xf97   :  { %2008 = vrot.lane.b32.xlu0 %v3786_v24, %s3411_s10 }
 0xf9a   :  { %2004 = vrot.lane.b32.xlu1 %v3786_v24, %s3409_s8 }
 0xf9b   :  { %2002 = vrot.lane.b32.xlu0 %v3788_v26, %s3409_s8 }
0x1000   :  { %v1710_v18 = vpop.xlane.xlu1 %1709 }
0x1001   :  { %3321 = vrcp.f32 %v1710_v18 }
0x1002   :  { %v1707_v22 = vpop.xlane.xlu0 %1706 }
0x1003   :  { %3323 = vrcp.f32 %v1707_v22 }
0x100a   :  { %v1907_v51 = vpop.xlane.xlu0 %1906 }
0x100b   :  { %3325 = vrcp.f32 %v1907_v51 }
0x100e   :  { %v1910_v25 = vpop.xlane.xlu1 %1909  ;;  %v3322_v16 = vpop.eup %3321 }
0x100f   :  { %3327 = vrcp.f32 %v1910_v25  ;;  %v1714_v30 = vmul.f32 %v3322_v16, %v3314_v1  ;;  %v2009_v31 = vpop.permute.xlu0 %2008 }
0x1010   :  { %v3324_v27 = vpop.eup %3323 }
0x1011   :  { %v1712_v29 = vmul.f32 %v3324_v27, %v3316_v6  ;;  %v3358_v27 = vld [vmem:[%s3997_s3 + $0x8] sm:$0xff] }
0x1012   :  { %v2007_v38 = vpop.permute.xlu1 %2006 }
0x1013   :  { %3171 = vmatprep.mubr.msk.f32.mxu0 %vm398_vm14, %v1712_v29  ;;  %v2003_v37 = vpop.permute.xlu0 %2002 }
0x1014   :  { %3172 = vmatmul.mubr.msk.f32.vlgmr.msra.gmra.mxu0 %vm398_vm14, %v1714_v30 }
0x1015   :  { %3182 = vmatpush3.msra.mxu0 %v1918_v11 }
0x1016   :  { %3183 = vmatprep.subr.mxu0 %v1916_v44  ;;  %v2005_v39 = vpop.permute.xlu1 %2004 }
0x1017   :  { %3184 = vmatpush3.msra.mxu0 %v1916_v44 }
0x1018   :  { %v3326_v32 = vpop.eup %3325  ;;  %3188 = vmatprep.subr.msk.mxu0 %vm314_vm13, %v2009_v31 }
0x1019   :  { %v1912_v33 = vmul.f32 %v3326_v32, %v3318_v14 }
0x101b   :  { %3185 = vmatprep.mubr.msk.f32.mxu0 %vm398_vm14, %v1912_v33 }
0x101c   :  { %v3328_v34 = vpop.eup %3327 }
0x101d   :  { %v1914_v35 = vmul.f32 %v3328_v34, %v3320_v17 }
0x101f   :  { %3186 = vmatmul.mubr.msk.f32.vlgmr.msra.gmra.mxu0 %vm398_vm14, %v1914_v35 }
0x1020   :  { %3189 = vmatpush3.xpose.msk.msra.mxu0 %vm314_vm13, %v2009_v31  ;;  %3192 = vmatprep.mubr.msk.f32.mxu0 %vm314_vm13, %v2003_v37 }
0x1021   :  { %3190 = vmatprep.subr.msk.mxu0 %vm314_vm13, %v2007_v38 }
0x1024   :  { %3191 = vmatpush3.xpose.msk.msra.mxu0 %vm314_vm13, %v2007_v38 }
0x1027   :  { %3193 = vmatmul.mubr.msk.f32.vlgmr.msra.gmra.mxu0 %vm314_vm13, %v2005_v39 }
0x10d4   :  { %v3854_v40 = vpop.f32.mrf.mxu0 }
0x10d6   :  { %v3856_v41 = vpop.f32.mrf.mxu0 }
0x10df   :  { %v3858_v45 = vpop.f32.mrf.mxu0 }
0x10e1   :  { %v3860_v50 = vpop.f32.mrf.mxu0 }
0x10e7   :  { %v3194_v49 = vpop.f32.mrf.mxu0 }
0x10e8   :  { %v2090_v46 = vadd.f32 %v3194_v49, %v3600_v12 }
0x10e9   :  { %v2084_v9 = vpop.f32.mrf.mxu0 }
0x10ea   :  { %v2085_v48 = vadd.f32 %v3357_v47, %v2084_v9  ;;  %v2096_v52 = vsel %vm398_vm14, %v2090_v46, -inf }
0x10eb   :  { %2097 = vmax.xlane.f32.xlu1 %v2096_v52 }
0x10ec   :  { %v2093_v53 = vsel %vm398_vm14, %v2085_v48, -inf }
0x10ed   :  { %2094 = vmax.xlane.f32.xlu0 %v2093_v53 }
0x10fc   :  { %2115 = vrot.lane.b32.xlu1 %v3788_v26, %s3413_s14 }
0x1100   :  { %2208 = vrot.lane.b32.xlu1 %v3786_v24, %s3414_s15 }
0x1104   :  { %2206 = vrot.lane.b32.xlu1 %v3788_v26, %s3414_s15 }
0x1108   :  { %2204 = vrot.lane.b32.xlu1 %v3786_v24, %s3415_s16 }
0x1174   :  { %v2098_v12 = vpop.xlane.xlu1 %2097 }
0x1175   :  { %v2100_v55 = vsub.f32 %v2090_v46, %v2098_v12 }
0x1176   :  { %v2095_v57 = vpop.xlane.xlu0 %2094 }
0x1177   :  { %v2103_v58 = vmul.f32 1.442695, %v2100_v55  ;;  %v2099_v59 = vsub.f32 %v2085_v48, %v2095_v57 }
0x1178   :  { %v2116_v6 = vpop.permute.xlu1 %2115 }
0x1179   :  { %3329 = vpow2.f32 %v2103_v58  ;;  %v2101_v42 = vmul.f32 1.442695, %v2099_v59 }
0x117b   :  { %3331 = vpow2.f32 %v2101_v42 }
0x117c   :  { %v2209_v11 = vpop.permute.xlu1 %2208 }
0x1180   :  { %v2207_v18 = vpop.permute.xlu1 %2206 }
0x1184   :  { %v2205_v22 = vpop.permute.xlu1 %2204 }
0x1186   :  { %v3330_v54 = vpop.eup %3329 }
0x1187   :  { %v2108_v63 = vsel %vm398_vm14, %v3330_v54, 0.0 }
0x1188   :  { %v3332_v0 = vpop.eup %3331  ;;  %2109 = vadd.xlane.f32.xlu0 %v2108_v63 }
0x1189   :  { %v2105_v1 = vsel %vm398_vm14, %v3332_v0, 0.0 }
0x118c   :  { %2106 = vadd.xlane.f32.xlu0 %v2105_v1 }
0x11a2   :  { %2117 = vrot.lane.b32.xlu0 %v3786_v24, %s3413_s14 }
0x11a6   :  { %2202 = vrot.lane.b32.xlu0 %v3788_v26, %s3415_s16 }
0x1211   :  { %v2110_v3 = vpop.xlane.xlu0 %2109 }
0x1212   :  { %3333 = vrcp.f32 %v2110_v3 }
0x1215   :  { %v2107_v4 = vpop.xlane.xlu0 %2106 }
0x1216   :  { %3335 = vrcp.f32 %v2107_v4 }
0x1219   :  { %v2118_v8 = vpop.permute.xlu0 %2117 }
0x121a   :  { %3195 = vmatprep.subr.mxu1 %v2118_v8 }
0x121b   :  { %3196 = vmatpush3.msra.mxu1 %v2118_v8 }
0x121c   :  { %3197 = vmatprep.subr.mxu1 %v2116_v6 }
0x121d   :  { %3198 = vmatpush3.msra.mxu1 %v2116_v6  ;;  %v2203_v44 = vpop.permute.xlu0 %2202 }
0x121e   :  { %3202 = vmatprep.subr.msk.mxu1 %vm314_vm13, %v2209_v11 }
0x121f   :  { %v3334_v14 = vpop.eup %3333 }
0x1220   :  { %v2114_v5 = vmul.f32 %v3334_v14, %v3330_v54 }
0x1223   :  { %v3336_v15 = vpop.eup %3335 }
0x1224   :  { %v2112_v17 = vmul.f32 %v3336_v15, %v3332_v0 }
0x1226   :  { %3199 = vmatprep.mubr.msk.f32.mxu1 %vm398_vm14, %v2112_v17 }
0x1227   :  { %3200 = vmatmul.mubr.msk.f32.vlgmr.msra.gmra.mxu1 %vm398_vm14, %v2114_v5 }
0x1228   :  { %3203 = vmatpush3.xpose.msk.msra.mxu1 %vm314_vm13, %v2209_v11  ;;  %3206 = vmatprep.mubr.msk.f32.mxu1 %vm314_vm13, %v2203_v44 }
0x1229   :  { %3204 = vmatprep.subr.msk.mxu1 %vm314_vm13, %v2207_v18 }
0x122c   :  { %3205 = vmatpush3.xpose.msk.msra.mxu1 %vm314_vm13, %v2207_v18 }
0x122f   :  { %3207 = vmatmul.mubr.msk.f32.vlgmr.msra.gmra.mxu1 %vm314_vm13, %v2205_v22 }
0x12e7   :  { %v3201_v51 = vpop.f32.mrf.mxu1 }
0x12e9   :  { %v2193_v25 = vpop.f32.mrf.mxu1 }
0x12ef   :  { %v3208_v16 = vpop.f32.mrf.mxu1 }
0x12f0   :  { %v2290_v29 = vadd.f32 %v3358_v27, %v3208_v16 }
0x12f1   :  { %v2284_v30 = vpop.f32.mrf.mxu1 }
0x12f2   :  { %v2285_v31 = vadd.f32 %v3357_v47, %v2284_v30  ;;  %v2296_v32 = vsel %vm398_vm14, %v2290_v29, -inf }
0x12f3   :  { %2297 = vmax.xlane.f32.xlu1 %v2296_v32 }
0x12f4   :  { %v2293_v33 = vsel %vm398_vm14, %v2285_v31, -inf }
0x12f5   :  { %2294 = vmax.xlane.f32.xlu0 %v2293_v33 }
0x1304   :  { %2315 = vrot.lane.b32.xlu1 %v3788_v26, %s3418_s19 }
0x1308   :  { %2446 = vrot.lane.b32.xlu1 %v3747_v43, %s3419_s20 }
0x130c   :  { %2444 = vrot.lane.b32.xlu1 %v3749_v61, %s3419_s20 }
0x1310   :  { %2442 = vrot.lane.b32.xlu1 %v3753_v62, %s3419_s20 }
0x1314   :  { %2412 = vrot.lane.b32.xlu1 %v2193_v25, %s3420_s21 }
0x137c   :  { %v2298_v34 = vpop.xlane.xlu1 %2297 }
0x137d   :  { %v2300_v35 = vsub.f32 %v2290_v29, %v2298_v34  ;;  %v2900_v34 = vld [vmem:[%s3999_s5 + $0x50] sm:$0xff] }
0x137e   :  { %v2295_v37 = vpop.xlane.xlu0 %2294 }
0x137f   :  { %v2303_v38 = vmul.f32 1.442695, %v2300_v35  ;;  %v2299_v39 = vsub.f32 %v2285_v31, %v2295_v37  ;;  %v2899_v35 = vld [vmem:[%s3999_s5 + $0x48] sm:$0xff]  ;;  %v2898_v37 = vld [vmem:[%s3999_s5 + $0x40] sm:$0xff] }
0x1380   :  { %v2316_v47 = vpop.permute.xlu1 %2315 }
0x1381   :  { %3337 = vpow2.f32 %v2303_v38  ;;  %v2301_v49 = vmul.f32 1.442695, %v2299_v39 }
0x1383   :  { %3339 = vpow2.f32 %v2301_v49 }
0x138e   :  { %v3338_v26 = vpop.eup %3337 }
0x138f   :  { %v2308_v46 = vsel %vm398_vm14, %v3338_v26, 0.0 }
0x1390   :  { %v3340_v43 = vpop.eup %3339  ;;  %2309 = vadd.xlane.f32.xlu0 %v2308_v46 }
0x1391   :  { %v2305_v61 = vsel %vm398_vm14, %v3340_v43, 0.0 }
0x1394   :  { %2306 = vadd.xlane.f32.xlu0 %v2305_v61  ;;  %v2564_v61 = vrot.slane %v3782_v21, %v1271_v56  ;;  %v2905_v56 = vld [vmem:[%s3999_s5 + $0x78] sm:$0xff] }
0x13aa   :  { %2317 = vrot.lane.b32.xlu0 %v3786_v24, %s3418_s19  ;;  %v2447_v24 = vpop.permute.xlu1 %2446 }
0x13ae   :  { %2404 = vrot.lane.b32.xlu0 %v3860_v50, %s3405_s28 }
0x13b2   :  { %2406 = vrot.lane.b32.xlu0 %v3858_v45, %s3405_s28  ;;  %v2445_v45 = vpop.permute.xlu1 %2444 }
0x13b6   :  { %2414 = vrot.lane.b32.xlu0 %v3201_v51, %s3420_s21 }
0x13ba   :  { %2440 = vrot.lane.b32.xlu0 %v3757_v28, %s3419_s20  ;;  %v2443_v28 = vpop.permute.xlu1 %2442 }
0x13be   :  { %v2413_v63 = vpop.permute.xlu1 %2412 }
0x1419   :  { %v2310_v62 = vpop.xlane.xlu0 %2309 }
0x141a   :  { %3341 = vrcp.f32 %v2310_v62 }
0x141d   :  { %v2307_v9 = vpop.xlane.xlu0 %2306 }
0x141e   :  { %3343 = vrcp.f32 %v2307_v9 }
0x1421   :  { %v2318_v48 = vpop.permute.xlu0 %2317 }
0x1422   :  { %3209 = vmatprep.subr.mxu0 %v2318_v48 }
0x1423   :  { %3210 = vmatpush3.msra.mxu0 %v2318_v48 }
0x1424   :  { %3211 = vmatprep.subr.mxu0 %v2316_v47 }
0x1425   :  { %3212 = vmatpush3.msra.mxu0 %v2316_v47  ;;  %v2405_v55 = vpop.permute.xlu0 %2404  ;;  %v2570_v47 = vrot.slane %v3782_v21, %v1277_v60  ;;  %v2903_v60 = vld [vmem:[%s3999_s5 + $0x68] sm:$0xff] }
0x1426   :  { %3216 = vmatprep.subr.mxu0 %v2447_v24  ;;  %v2426_v0 = vsel %vm314_vm13, %v3856_v41, %v2405_v55  ;;  %v2435_v41 = vrot.slane %v3782_v21, %v1141_v23  ;;  %v2586_v55 = vrot.slane %v3782_v21, %v1292_v10 }
0x1427   :  { %v3342_v50 = vpop.eup %3341  ;;  %v2428_v3 = vsel %vm398_vm14, %v2426_v0, %v2413_v63 }
0x1428   :  { %v2314_v12 = vmul.f32 %v3342_v50, %v3338_v26 }
0x1429   :  { %v2407_v57 = vpop.permute.xlu0 %2406 }
0x142a   :  { %v2427_v6 = vsel %vm314_vm13, %v3854_v40, %v2407_v57 }
0x142b   :  { %v3344_v52 = vpop.eup %3343 }
0x142c   :  { %v2312_v53 = vmul.f32 %v3344_v52, %v3340_v43 }
0x142d   :  { %v2415_v58 = vpop.permute.xlu0 %2414 }
0x142e   :  { %3213 = vmatprep.mubr.msk.f32.mxu0 %vm398_vm14, %v2312_v53  ;;  %v2429_v8 = vsel %vm398_vm14, %v2427_v6, %v2415_v58 }
0x142f   :  { %3214 = vmatmul.mubr.msk.f32.vlgmr.msra.gmra.mxu0 %vm398_vm14, %v2314_v12  ;;  %v2904_v12 = vld [vmem:[%s3999_s5 + $0x70] sm:$0xff] }
0x1430   :  { %3217 = vmatpush3.msra.mxu0 %v2447_v24 }
0x1431   :  { %3218 = vmatprep.subr.mxu0 %v2445_v45  ;;  %v2441_v59 = vpop.permute.xlu0 %2440 }
0x1432   :  { %3219 = vmatpush3.msra.mxu0 %v2445_v45 }
0x1433   :  { %3220 = vmatprep.subr.mxu0 %v2443_v28 }
0x1434   :  { %3221 = vmatpush3.msra.mxu0 %v2443_v28  ;;  %v2902_v28 = vld [vmem:[%s3999_s5 + $0x60] sm:$0xff] }
0x1435   :  { %3222 = vmatprep.subr.mxu0 %v2441_v59 }
0x1436   :  { %3223 = vmatpush3.msra.mxu0 %v2441_v59 }
0x1437   :  { %3238 = vmatprep.subr.mxu0 %v2905_v56 }
0x14ef   :  { %v3215_v42 = vpop.f32.mrf.mxu0 }
0x14f1   :  { %v2393_v54 = vpop.f32.mrf.mxu0 }
0x14f2   :  { %2420 = vrot.lane.b32.xlu1 %v2393_v54, %s3421_s22 }
0x14f6   :  { %2422 = vrot.lane.b32.xlu1 %v3215_v42, %s3421_s22 }
0x1564   :  { %v2421_v1 = vpop.permute.xlu1 %2420 }
0x1565   :  { %v2430_v4 = vsel %vm1136_vm15, %v2428_v3, %v2421_v1 }
0x1566   :  { %3224 = vmatprep.mubr.msk.f32.mxu0 %vm226_vm12, %v2430_v4 }
0x1568   :  { %v2423_v11 = vpop.permute.xlu1 %2422 }
0x1569   :  { %v2431_v14 = vsel %vm1136_vm15, %v2429_v8, %v2423_v11 }
0x156a   :  { %3225 = vmatmul.mubr.msk.f32.vlgmr.msra.gmra.mxu0 %vm226_vm12, %v2431_v14 }
0x156b   :  { %3239 = vmatpush3.xpose.msra.mxu0 %v2905_v56 }
0x156c   :  { %3240 = vmatprep.subr.mxu0 %v2904_v12 }
0x156f   :  { %3241 = vmatpush3.xpose.msra.mxu0 %v2904_v12 }
0x1570   :  { %3242 = vmatprep.subr.mxu0 %v2903_v60 }
0x1573   :  { %3243 = vmatpush3.xpose.msra.mxu0 %v2903_v60 }
0x1574   :  { %3244 = vmatprep.subr.mxu0 %v2902_v28 }
0x1577   :  { %3245 = vmatpush3.xpose.msra.mxu0 %v2902_v28 }
0x162a   :  { %v3226_v15 = vpop.f32.mrf.mxu0 }
0x162b   :  { %v2530_v17 = vadd.f32 %v3226_v15, %v2435_v41 }
0x162c   :  { %v2524_v5 = vpop.f32.mrf.mxu0 }
0x162d   :  { %v2534_v44 = vadd.f32 %v2530_v17, %v3773_v20  ;;  %v2525_v18 = vadd.f32 %v2524_v5, %v2435_v41 }
0x162f   :  { %v2538_v22 = vsel %vm226_vm12, %v2534_v44, 0.0  ;;  %v2533_v40 = vadd.f32 %v2525_v18, %v3771_v19  ;;  %v2901_v19 = vld [vmem:[%s3999_s5 + $0x58] sm:$0xff]  ;;  %s3422_s5 = smov [#allocation5]  }
0x1630   :  { %2539 = vadd.xlane.f32.xlu1 %v2538_v22  ;;  %3227 = vmatprep.subr.mxu1 %v2901_v19  ;;  %s2812_s23 = sshll.u32 %s3422_s5, 4  ;;  %s2813_s23 = int_to_ptr.vmem [resolvable:$true] %s2812_s23 }
0x1631   :  { %v2535_v51 = vsel %vm226_vm12, %v2533_v40, 0.0  ;;  %3228 = vmatpush3.msra.mxu1 %v2901_v19  ;;  %s3379_s1 = scalar_lea.vmem %s2813_s23, 256  ;;  %p3384_p6 = scmp.lt.s32.totalorder %s2813_s23, %s2813_s23 }
0x1632   :  { %2536 = vadd.xlane.f32.xlu0 %v2535_v51  ;;  %3229 = vmatprep.subr.mxu1 %v2900_v34  ;;  %p3380_p5 = scmp.ne.s32.totalorder %s2813_s23, %s3379_s1  ;;  %p3385_p7 = scmp.lt.s32.totalorder %s3379_s1, %s3379_s1 }
0x1633   :  { %3230 = vmatpush3.msra.mxu1 %v2900_v34 }
0x1634   :  { %3231 = vmatprep.subr.mxu1 %v2899_v35  ;;  %p3386_p8 = por %p3385_p7, %p3384_p6 }
0x1635   :  { %3232 = vmatpush3.msra.mxu1 %v2899_v35 }
0x1636   :  { %3233 = vmatprep.subr.mxu1 %v2898_v37  ;;  %p3387_p9 = pnand %p3386_p8, %p3380_p5 }
0x1637   :  { %3234 = vmatpush3.msra.mxu1 %v2898_v37 }
0x16b9   :  { %v2540_v25 = vpop.xlane.xlu1 %2539 }
0x16ba   :  { %v2542_v16 = vmul.f32 0.03125, %v2540_v25 }
0x16bb   :  { %v2537_v27 = vpop.xlane.xlu0 %2536 }
0x16bc   :  { %v2541_v29 = vmul.f32 0.03125, %v2537_v27  ;;  %v2544_v30 = vsub.f32 %v2534_v44, %v2542_v16 }
0x16be   :  { %v2543_v23 = vsub.f32 %v2533_v40, %v2541_v29  ;;  %v2546_v33 = vmul.f32 %v2544_v30, %v2544_v30  ;;  %v2689_v40 = vrot.slane %v3782_v21, %v1395_v36 }
0x16c0   :  { %v2545_v31 = vmul.f32 %v2543_v23, %v2543_v23  ;;  %v2550_v20 = vsel %vm226_vm12, %v2546_v33, 0.0 }
0x16c2   :  { %v2547_v32 = vsel %vm226_vm12, %v2545_v31, 0.0 }
0x16c3   :  { %2548 = vadd.xlane.f32.xlu0 %v2547_v32 }
0x16c7   :  { %2551 = vadd.xlane.f32.xlu0 %v2550_v20 }
0x174c   :  { %v2549_v38 = vpop.xlane.xlu0 %2548 }
0x174d   :  { %v2553_v39 = vmul.f32 0.03125, %v2549_v38 }
0x174f   :  { %v2555_v49 = vadd.f32 1e-05, %v2553_v39 }
0x1750   :  { %v2552_v26 = vpop.xlane.xlu0 %2551 }
0x1751   :  { %3345 = vrsqrt.f32 %v2555_v49  ;;  %v2554_v46 = vmul.f32 0.03125, %v2552_v26 }
0x1753   :  { %v2556_v43 = vadd.f32 1e-05, %v2554_v46 }
0x1755   :  { %3347 = vrsqrt.f32 %v2556_v43 }
0x175e   :  { %v3346_v62 = vpop.eup %3345 }
0x175f   :  { %v2559_v9 = vmul.f32 %v3346_v62, %v2543_v23 }
0x1761   :  { %v2565_v48 = vmul.f32 %v2564_v61, %v2559_v9  ;;  %v2796_v9 = vrot.slane %v3782_v21, %v1502_v7 }
0x1762   :  { %v3348_v24 = vpop.eup %3347 }
0x1763   :  { %v2560_v50 = vmul.f32 %v3348_v24, %v2544_v30  ;;  %v2571_v52 = vadd.f32 %v2570_v47, %v2565_v48  ;;  %v2802_v24 = vrot.slane %v3782_v21, %v1508_v13 }
0x1765   :  { %v2566_v45 = vmul.f32 %v2564_v61, %v2560_v50  ;;  %3235 = vmatprep.mubr.msk.f32.mxu1 %vm226_vm12, %v2571_v52 }
0x1767   :  { %v2572_v53 = vadd.f32 %v2570_v47, %v2566_v45 }
0x1769   :  { %3236 = vmatmul.mubr.msk.f32.vlgmr.msra.gmra.mxu1 %vm226_vm12, %v2572_v53 }
0x1829   :  { %v3237_v57 = vpop.f32.mrf.mxu1 }
0x182a   :  { %v2665_v58 = vadd.f32 %v3237_v57, %v2586_v55 }
0x182b   :  { %v2659_v59 = vpop.f32.mrf.mxu1 }
0x182c   :  { %v2671_v42 = vmul.f32 0.044715, %v2665_v58  ;;  %v2660_v54 = vadd.f32 %v2659_v59, %v2586_v55  ;;  %v2669_v44 = vmul.f32 0.5, %v2665_v58 }
0x182e   :  { %v2673_v63 = vmul.f32 %v2671_v42, %v2665_v58  ;;  %v2670_v0 = vmul.f32 0.044715, %v2660_v54  ;;  %v2668_v10 = vmul.f32 0.5, %v2660_v54 }
0x1830   :  { %v2675_v1 = vmul.f32 %v2673_v63, %v2665_v58  ;;  %v2672_v3 = vmul.f32 %v2670_v0, %v2660_v54 }
0x1832   :  { %v2677_v4 = vadd.f32 %v2675_v1, %v2665_v58  ;;  %v2674_v6 = vmul.f32 %v2672_v3, %v2660_v54 }
0x1834   :  { %v2676_v8 = vadd.f32 %v2674_v6, %v2660_v54  ;;  %v2679_v11 = vmul.f32 0.7978845, %v2677_v4 }
0x1836   :  { %v2678_v14 = vmul.f32 0.7978845, %v2676_v8  ;;  %3349 = vtanh.f32 %v2679_v11 }
0x1838   :  { %3351 = vtanh.f32 %v2678_v14 }
0x1843   :  { %v3350_v41 = vpop.eup %3349 }
0x1844   :  { %v2683_v17 = vadd.f32 1.0, %v3350_v41 }
0x1845   :  { %v3352_v15 = vpop.eup %3351 }
0x1846   :  { %v2682_v5 = vadd.f32 1.0, %v3352_v15  ;;  %v2685_v22 = vmul.f32 %v2683_v17, %v2669_v44 }
0x1848   :  { %v2684_v18 = vmul.f32 %v2682_v5, %v2668_v10 }
0x184a   :  { %3246 = vmatprep.mubr.f32.mxu0 %v2684_v18 }
0x184b   :  { %3247 = vmatmul.mubr.f32.vlgmr.msra.gmra.mxu0 %v2685_v22 }
0x190b   :  { %v3248_v51 = vpop.f32.mrf.mxu0 }
0x190c   :  { %v2762_v25 = vadd.f32 %v3248_v51, %v2689_v40 }
0x190d   :  { %v2756_v16 = vpop.f32.mrf.mxu0 }
0x190e   :  { %v2766_v27 = vadd.f32 %v2762_v25, %v2572_v53  ;;  %v2757_v29 = vadd.f32 %v2756_v16, %v2689_v40 }
0x1910   :  { %v2770_v30 = vsel %vm226_vm12, %v2766_v27, 0.0  ;;  %v2765_v23 = vadd.f32 %v2757_v29, %v2571_v52 }
0x1911   :  { %2771 = vadd.xlane.f32.xlu1 %v2770_v30 }
0x1912   :  { %v2767_v31 = vsel %vm226_vm12, %v2765_v23, 0.0 }
0x1913   :  { %2768 = vadd.xlane.f32.xlu0 %v2767_v31 }
0x199a   :  { %v2772_v32 = vpop.xlane.xlu1 %2771 }
0x199b   :  { %v2774_v33 = vmul.f32 0.03125, %v2772_v32 }
0x199c   :  { %v2769_v20 = vpop.xlane.xlu0 %2768 }
0x199d   :  { %v2776_v19 = vsub.f32 %v2766_v27, %v2774_v33  ;;  %v2773_v34 = vmul.f32 0.03125, %v2769_v20 }
0x199f   :  { %v2775_v35 = vsub.f32 %v2765_v23, %v2773_v34  ;;  %v2778_v37 = vmul.f32 %v2776_v19, %v2776_v19 }
0x19a1   :  { %v2782_v36 = vsel %vm226_vm12, %v2778_v37, 0.0  ;;  %v2777_v38 = vmul.f32 %v2775_v35, %v2775_v35 }
0x19a2   :  { %2783 = vadd.xlane.f32.xlu1 %v2782_v36 }
0x19a3   :  { %v2779_v39 = vsel %vm226_vm12, %v2777_v38, 0.0 }
0x19a4   :  { %2780 = vadd.xlane.f32.xlu0 %v2779_v39 }
0x1a2b   :  { %v2784_v49 = vpop.xlane.xlu1 %2783 }
0x1a2c   :  { %v2786_v26 = vmul.f32 0.03125, %v2784_v49 }
0x1a2d   :  { %v2781_v46 = vpop.xlane.xlu0 %2780 }
0x1a2e   :  { %v2788_v43 = vadd.f32 1e-05, %v2786_v26  ;;  %v2785_v61 = vmul.f32 0.03125, %v2781_v46 }
0x1a30   :  { %3353 = vrsqrt.f32 %v2788_v43  ;;  %v2787_v62 = vadd.f32 1e-05, %v2785_v61 }
0x1a32   :  { %3355 = vrsqrt.f32 %v2787_v62 }
0x1a3d   :  { %v3354_v47 = vpop.eup %3353 }
0x1a3e   :  { %v2792_v48 = vmul.f32 %v3354_v47, %v2776_v19 }
0x1a3f   :  { %v3356_v50 = vpop.eup %3355 }
0x1a40   :  { %v2791_v52 = vmul.f32 %v3356_v50, %v2775_v35  ;;  %v2798_v45 = vmul.f32 %v2796_v9, %v2792_v48 }
0x1a42   :  { %v2797_v53 = vmul.f32 %v2796_v9, %v2791_v52  ;;  %v2804_v56 = vadd.f32 %v2802_v24, %v2798_v45 }
0x1a44   :  { %v2803_v12 = vadd.f32 %v2802_v24, %v2797_v53  ;;  %2806 = vst.msk [vmem:[#allocation5 + $0x8] sm:$0xff] %vm226_vm12, %v2804_v56 }
0x1a46   :  { %2805 = vst.msk [vmem:[#allocation5] sm:$0xff] %vm226_vm12, %v2803_v12 }
0x1a47   :  { %3390 = shalt.err (!%p3387_p9)
}
0x1a48   :  { %2818 = dma.vmem_to_hbm [thread:$0]  %s2813_s23, 256, %s4001_s7, [#allocation4], %s3404_s27, %s3404_s27, %s3405_s28  }
0x1a49   :  { %3401 = dma.done.wait [#allocation4], 256  }
0x1a4a   :  { %3402 = vsyncadd [#allocation4], 4294967040 }
0x1a4b   :  { %2822 = vsyncpa [#allocation3], 1 }
0x1a4c   :  { %2823 = vsyncpa [#allocation4], 1 }

</bundles_post_ra>
